<compile_context>
chip_gen: v5e
topology: v5e:2x2
jax: 0.10.0
libtpu: 0.0.40
codegen_flags: <defaults>
</compile_context>

<pallas_src>
import functools

import jax
import jax.numpy as jnp
from jax.experimental import pallas as pl
from jax.experimental.pallas import tpu as pltpu

KERNEL_K = 5      # 'K5'
BN_EPS = 1e-5
LANE = 128


def _round_up(v, m):
    return (v + m - 1) // m * m


def _out_len(t):
    # ['K5', 'P2', 'K5', 'P2'] applied to an integer length
    return ((t - (KERNEL_K - 1)) // 2 - (KERNEL_K - 1)) // 2


def _fused_kernel(x_ref, w1_ref, g1_ref, be1_ref, w2_ref, g2_ref, be2_ref,
                  fw_ref, fb_ref, feat_ref, logit_ref, p1_ref, *, n_batch):
    """One temporal path per grid step (grid=(3,): main/slow/fast).

    x_ref   : (T*N, C)        bf16, rows = t*N + n (shared across paths)
    w1_ref  : (K*C, Hp)       bf16  (im2col layout, zero rows implement the
                                     slow/fast channel slicing)
    w2_ref  : (K, Hp, Hp)     bf16
    g*/be*  : (1, Hp)         f32   (BN gamma/beta; conv biases cancel under BN)
    fw_ref  : (Hp, NCp) bf16, fb_ref: (1, NCp) f32
    feat_ref: (Lf, N, Hp) f32, logit_ref: (Lf, N, NCp) f32   (L, N, C order)
    p1_ref  : VMEM scratch (Lp1*N, Hp) f32 for the pooled conv1 output.
    """
    rows_in = x_ref.shape[0]
    t_in = rows_in // n_batch
    hp = w2_ref.shape[-1]
    ncp = fw_ref.shape[-1]

    def bn_relu(acc, g, be):
        # BatchNorm1d (training): per-channel stats over (N, L); one-pass var.
        mu = jnp.mean(acc, axis=0, keepdims=True)
        ex2 = jnp.mean(acc * acc, axis=0, keepdims=True)
        var = jnp.maximum(ex2 - mu * mu, 0.0)          # biased variance
        y = (acc - mu) * jax.lax.rsqrt(var + BN_EPS) * g + be
        return jnp.maximum(y, 0.0)                     # ReLU

    def maxpool2_flat(y):
        # y: (L*N, H) with row = l*N + n; MaxPool1d(2), floor.
        rows, h = y.shape
        l = rows // n_batch
        lp = l // 2
        yb = y[: 2 * lp * n_batch, :].reshape(lp, 2 * n_batch, h)
        return jnp.maximum(yb[:, :n_batch, :], yb[:, n_batch:, :]).reshape(
            lp * n_batch, h)

    # ---- conv1 (K5): im2col -> single MXU pass -----------------------------
    l1 = t_in - (KERNEL_K - 1)
    taps = [x_ref[t * n_batch:(t + l1) * n_batch, :] for t in range(KERNEL_K)]
    xcat = jnp.concatenate(taps, axis=-1)                       # (l1*N, K*C) bf16
    acc1 = jnp.dot(xcat, w1_ref[...], preferred_element_type=jnp.float32)
    y1 = bn_relu(acc1, g1_ref[...], be1_ref[...])
    p1_ref[...] = maxpool2_flat(y1)                             # (lp1*N, Hp) f32

    # ---- conv2 (K5): 5-tap accumulate (contraction = Hp) -------------------
    lp1 = l1 // 2
    l2 = lp1 - (KERNEL_K - 1)
    acc2 = jnp.zeros((l2 * n_batch, hp), jnp.float32)
    for t in range(KERNEL_K):                                   # static unrolled
        xs = p1_ref[t * n_batch:(t + l2) * n_batch, :].astype(jnp.bfloat16)
        acc2 = acc2 + jnp.dot(xs, w2_ref[t], preferred_element_type=jnp.float32)
    y2 = bn_relu(acc2, g2_ref[...], be2_ref[...])
    feat = maxpool2_flat(y2)                                    # (lf*N, Hp) f32

    lf = l2 // 2
    feat_ref[...] = feat.reshape(lf, n_batch, hp)               # (L, N, H) direct

    # ---- per-path linear head (lane-padded classes) ------------------------
    logits = jnp.dot(feat.astype(jnp.bfloat16), fw_ref[...],
                     preferred_element_type=jnp.float32) + fb_ref[...]
    logit_ref[...] = logits.reshape(lf, n_batch, ncp)


@functools.partial(jax.jit, static_argnames=("n_batch",))
def _run_fused(x2d, w1, g1, be1, w2, g2, be2, fw, fb, *, n_batch):
    rows, c_main = x2d.shape
    t_len = rows // n_batch
    hp = w2.shape[-1]
    ncp = fw.shape[-1]
    l1 = t_len - (KERNEL_K - 1)
    lp1 = l1 // 2
    l2 = lp1 - (KERNEL_K - 1)
    lf = l2 // 2

    # NOTE: for production shapes (hidden 512-1024, long T) add an H-tile grid
    # axis (BN stats are per-channel, so H tiling is exact) and/or set
    # vmem_limit_bytes; the demo shapes below fit comfortably in scoped VMEM.
    kernel = functools.partial(_fused_kernel, n_batch=n_batch)
    return pl.pallas_call(
        kernel,
        grid=(3,),
        out_shape=(jax.ShapeDtypeStruct((3, lf, n_batch, hp), jnp.float32),
                   jax.ShapeDtypeStruct((3, lf, n_batch, ncp), jnp.float32)),
        in_specs=[
            pl.BlockSpec((rows, c_main), lambda p: (0, 0)),            # x, shared
            pl.BlockSpec((None, w1.shape[1], hp), lambda p: (p, 0, 0)),   # w1 im2col
            pl.BlockSpec((None, 1, hp), lambda p: (p, 0, 0)),             # gamma1
            pl.BlockSpec((None, 1, hp), lambda p: (p, 0, 0)),             # beta1
            pl.BlockSpec((None, KERNEL_K, hp, hp), lambda p: (p, 0, 0, 0)),  # w2
            pl.BlockSpec((None, 1, hp), lambda p: (p, 0, 0)),             # gamma2
            pl.BlockSpec((None, 1, hp), lambda p: (p, 0, 0)),             # beta2
            pl.BlockSpec((None, hp, ncp), lambda p: (p, 0, 0)),           # fc weight
            pl.BlockSpec((None, 1, ncp), lambda p: (p, 0, 0)),            # fc bias
        ],
        out_specs=(
            pl.BlockSpec((None, lf, n_batch, hp), lambda p: (p, 0, 0, 0)),
            pl.BlockSpec((None, lf, n_batch, ncp), lambda p: (p, 0, 0, 0)),
        ),
        scratch_shapes=[pltpu.VMEM((lp1 * n_batch, hp), jnp.float32)],
        compiler_params=pltpu.CompilerParams(
            dimension_semantics=("parallel",)),
    )(x2d, w1, g1, be1, w2, g2, be2, fw, fb)


def init_path_params(key, c_in, hidden, num_classes):
    """Weights in kernel-friendly layouts: conv w is (K, C_in, H) (torch: (H, C_in, K)),
    fc weight is (H, num_classes) (torch: (num_classes, H))."""
    ks = jax.random.split(key, 6)
    return dict(
        w1=jax.random.normal(ks[0], (KERNEL_K, c_in, hidden), jnp.float32) * 0.1,
        # Conv biases exist in the torch module but cancel exactly under
        # training-mode BatchNorm (mean subtraction); they are not used by the kernel.
        b1=jax.random.normal(ks[1], (hidden,), jnp.float32) * 0.1,
        g1=jnp.ones((hidden,), jnp.float32),
        be1=jnp.zeros((hidden,), jnp.float32),
        w2=jax.random.normal(ks[2], (KERNEL_K, hidden, hidden), jnp.float32) * 0.1,
        b2=jax.random.normal(ks[3], (hidden,), jnp.float32) * 0.1,
        g2=jnp.ones((hidden,), jnp.float32),
        be2=jnp.zeros((hidden,), jnp.float32),
        fw=jax.random.normal(ks[4], (hidden, num_classes), jnp.float32) * 0.1,
        fb=jax.random.normal(ks[5], (num_classes,), jnp.float32) * 0.1,
    )


def init_params(key, fast_input_size, slow_input_size, hidden, num_classes):
    kmain, kslow, kfast = jax.random.split(key, 3)
    main_input_size = fast_input_size + slow_input_size
    return dict(
        main=init_path_params(kmain, main_input_size, hidden, num_classes),
        slow=init_path_params(kslow, slow_input_size, hidden, num_classes),
        fast=init_path_params(kfast, fast_input_size, hidden, num_classes),
    )


def _pack_params(params, slow_in, fast_in, hidden, num_classes):
    """Stack per-path params along a leading path axis, lane-pad hidden /
    num_classes to multiples of 128, embed the slow/fast channel selection as
    zero rows in w1, and pre-cast matmul weights to bf16."""
    c_main = slow_in + fast_in
    hp = _round_up(hidden, LANE)
    ncp = _round_up(num_classes, LANE)

    def w1_full(p, col_off, c_in):
        w = jnp.zeros((KERNEL_K, c_main, hp), jnp.float32)
        w = w.at[:, col_off:col_off + c_in, :hidden].set(p['w1'])
        return w.reshape(KERNEL_K * c_main, hp)      # row = k*C + c (im2col order)

    w1 = jnp.stack([w1_full(params['main'], 0, c_main),
                    w1_full(params['slow'], 0, slow_in),
                    w1_full(params['fast'], slow_in, fast_in)]).astype(jnp.bfloat16)

    def stack_vec(name, pad_value):
        vs = []
        for k in ('main', 'slow', 'fast'):
            v = params[k][name].reshape(1, hidden).astype(jnp.float32)
            v = jnp.pad(v, ((0, 0), (0, hp - hidden)), constant_values=pad_value)
            vs.append(v)
        return jnp.stack(vs)                                     # (3, 1, Hp)

    g1, be1 = stack_vec('g1', 1.0), stack_vec('be1', 0.0)
    g2, be2 = stack_vec('g2', 1.0), stack_vec('be2', 0.0)

    def w2_full(p):
        w = jnp.zeros((KERNEL_K, hp, hp), jnp.float32)
        return w.at[:, :hidden, :hidden].set(p['w2'])

    w2 = jnp.stack([w2_full(params[k]) for k in ('main', 'slow', 'fast')]
                   ).astype(jnp.bfloat16)                        # (3, K, Hp, Hp)

    def fw_full(p):
        w = jnp.zeros((hp, ncp), jnp.float32)
        return w.at[:hidden, :num_classes].set(p['fw'])

    fw = jnp.stack([fw_full(params[k]) for k in ('main', 'slow', 'fast')]
                   ).astype(jnp.bfloat16)                        # (3, Hp, NCp)

    def fb_full(p):
        b = jnp.zeros((1, ncp), jnp.float32)
        return b.at[:, :num_classes].set(p['fb'].reshape(1, num_classes))

    fb = jnp.stack([fb_full(params[k]) for k in ('main', 'slow', 'fast')])

    return w1, g1, be1, w2, g2, be2, fw, fb


def temporal_slowfast_fuse_forward(frame_feat, lgt, params,
                                   slow_input_size, fast_input_size):
    """frame_feat: (N, C, T) like PyTorch Conv1d input (NCL). lgt: (N,) float lengths."""
    n, c_main, t = frame_feat.shape
    hidden = params['main']['w2'].shape[-1]
    num_classes = params['main']['fw'].shape[-1]

    packed = _pack_params(params, slow_input_size, fast_input_size,
                          hidden, num_classes)

    # NCL -> time-major flat (T*N, C): row = t*N + n, channels on lanes, bf16 for MXU.
    x2d = jnp.transpose(frame_feat, (2, 0, 1)).reshape(t * n, c_main
                                                       ).astype(jnp.bfloat16)

    feat_all, logit_all = _run_fused(x2d, *packed, n_batch=n)

    # Kernel already emits (L, N, C); just drop the lane padding.
    visual_feat = [feat_all[i, :, :, :hidden] for i in range(3)]       # main, slow, fast
    conv_logits = [logit_all[i, :, :, :num_classes] for i in range(3)]

    # update_lgt for ['K5','P2','K5','P2'] (torch.div is true division)
    feat_len = ((lgt.astype(jnp.float32) - 4.0) / 2.0 - 4.0) / 2.0

    return {'visual_feat': visual_feat,
            'conv_logits': conv_logits,
            'feat_len': feat_len}


if __name__ == "__main__":
    key = jax.random.PRNGKey(0)
    k_param, k_data = jax.random.split(key)

    # Small, module-consistent shapes.
    N = 2
    slow_input_size = 4
    fast_input_size = 12
    main_input_size = slow_input_size + fast_input_size   # 16
    hidden = 32
    num_classes = 10
    T = 32                                                 # 32 -> 28 -> 14 -> 10 -> 5

    params = init_params(k_param, fast_input_size, slow_input_size,
                         hidden, num_classes)

    frame_feat = jax.random.normal(k_data, (N, main_input_size, T), jnp.float32)
    lgt = jnp.array([32.0, 28.0], jnp.float32)

    out = temporal_slowfast_fuse_forward(frame_feat, lgt, params,
                                         slow_input_size, fast_input_size)

    for arr in out['visual_feat'] + out['conv_logits'] + [out['feat_len']]:
        jax.block_until_ready(arr)

    lf = _out_len(T)
    assert out['visual_feat'][0].shape == (lf, N, hidden)
    assert out['conv_logits'][0].shape == (lf, N, num_classes)
    assert len(out['visual_feat']) == 3 and len(out['conv_logits']) == 3

    print("KERNEL_OK")
</pallas_src>

<mosaic_0001>
module attributes {stable_mosaic.version = 11 : i64} {
  func.func @_fused_kernel(%arg0: i32, %arg1: memref<64x16xbf16, #tpu.memory_space<vmem>>, %arg2: memref<1x80x128xbf16, #tpu.memory_space<vmem>>, %arg3: memref<1x1x128xf32, #tpu.memory_space<vmem>>, %arg4: memref<1x1x128xf32, #tpu.memory_space<vmem>>, %arg5: memref<1x5x128x128xbf16, #tpu.memory_space<vmem>>, %arg6: memref<1x1x128xf32, #tpu.memory_space<vmem>>, %arg7: memref<1x1x128xf32, #tpu.memory_space<vmem>>, %arg8: memref<1x128x128xbf16, #tpu.memory_space<vmem>>, %arg9: memref<1x1x128xf32, #tpu.memory_space<vmem>>, %arg10: memref<1x5x2x128xf32, #tpu.memory_space<vmem>>, %arg11: memref<1x5x2x128xf32, #tpu.memory_space<vmem>>, %arg12: memref<28x128xf32, #tpu.memory_space<vmem>>) attributes {dimension_semantics = [#tpu.dimension_semantics<parallel>], iteration_bounds = array<i64: 3>, scalar_prefetch = 0 : i64, scratch_operands = 1 : i64, tpu.core_type = #tpu.core_type<tc>, window_params = [{pipeline_mode = #tpu.pipeline_mode<synchronous>, transform_indices = @transform_0, window_bounds = array<i64: 64, 16>}, {transform_indices = @transform_1, window_bounds = array<i64: 1, 80, 128>}, {transform_indices = @transform_2, window_bounds = array<i64: 1, 1, 128>}, {transform_indices = @transform_3, window_bounds = array<i64: 1, 1, 128>}, {transform_indices = @transform_4, window_bounds = array<i64: 1, 5, 128, 128>}, {transform_indices = @transform_5, window_bounds = array<i64: 1, 1, 128>}, {transform_indices = @transform_6, window_bounds = array<i64: 1, 1, 128>}, {transform_indices = @transform_7, window_bounds = array<i64: 1, 128, 128>}, {transform_indices = @transform_8, window_bounds = array<i64: 1, 1, 128>}, {transform_indices = @transform_9, window_bounds = array<i64: 1, 5, 2, 128>}, {transform_indices = @transform_10, window_bounds = array<i64: 1, 5, 2, 128>}]} {
    %c0 = arith.constant 0 : index
    %c0_0 = arith.constant 0 : index
    %0 = vector.load %arg1[%c0, %c0_0] : memref<64x16xbf16, #tpu.memory_space<vmem>>, vector<56x16xbf16>
    %c2 = arith.constant 2 : index
    %c0_1 = arith.constant 0 : index
    %1 = vector.load %arg1[%c2, %c0_1] : memref<64x16xbf16, #tpu.memory_space<vmem>>, vector<56x16xbf16>
    %c4 = arith.constant 4 : index
    %c0_2 = arith.constant 0 : index
    %2 = vector.load %arg1[%c4, %c0_2] : memref<64x16xbf16, #tpu.memory_space<vmem>>, vector<56x16xbf16>
    %c6 = arith.constant 6 : index
    %c0_3 = arith.constant 0 : index
    %3 = vector.load %arg1[%c6, %c0_3] : memref<64x16xbf16, #tpu.memory_space<vmem>>, vector<56x16xbf16>
    %c8 = arith.constant 8 : index
    %c0_4 = arith.constant 0 : index
    %4 = vector.load %arg1[%c8, %c0_4] : memref<64x16xbf16, #tpu.memory_space<vmem>>, vector<56x16xbf16>
    %5 = tpu.concatenate %0, %1, %2, %3, %4 in 1 : vector<56x16xbf16>, vector<56x16xbf16>, vector<56x16xbf16>, vector<56x16xbf16>, vector<56x16xbf16> -> vector<56x80xbf16>
    %c0_5 = arith.constant 0 : index
    %c0_6 = arith.constant 0 : index
    %c0_7 = arith.constant 0 : index
    %6 = vector.load %arg2[%c0_5, %c0_6, %c0_7] : memref<1x80x128xbf16, #tpu.memory_space<vmem>>, vector<1x80x128xbf16>
    %7 = vector.shape_cast %6 : vector<1x80x128xbf16> to vector<80x128xbf16>
    %cst = arith.constant dense<0.000000e+00> : vector<56x128xf32>
    %8 = tpu.matmul %5, %7, %cst {dimension_numbers = #tpu.dot_dimension_numbers<[1], [0], [0], [1], [0, 0, 1, 1], [], []>} : vector<56x80xbf16>, vector<80x128xbf16>, vector<56x128xf32> -> vector<56x128xf32>
    %c0_8 = arith.constant 0 : index
    %c0_9 = arith.constant 0 : index
    %c0_10 = arith.constant 0 : index
    %9 = vector.load %arg3[%c0_8, %c0_9, %c0_10] : memref<1x1x128xf32, #tpu.memory_space<vmem>>, vector<1x1x128xf32>
    %10 = vector.shape_cast %9 : vector<1x1x128xf32> to vector<1x128xf32>
    %c0_11 = arith.constant 0 : index
    %c0_12 = arith.constant 0 : index
    %c0_13 = arith.constant 0 : index
    %11 = vector.load %arg4[%c0_11, %c0_12, %c0_13] : memref<1x1x128xf32, #tpu.memory_space<vmem>>, vector<1x1x128xf32>
    %12 = vector.shape_cast %11 : vector<1x1x128xf32> to vector<1x128xf32>
    %cst_14 = arith.constant dense<0.000000e+00> : vector<128xf32>
    %13 = vector.multi_reduction <add>, %8, %cst_14 [0] : vector<56x128xf32> to vector<128xf32>
    %14 = vector.shape_cast %13 : vector<128xf32> to vector<1x128xf32>
    %cst_15 = arith.constant 5.600000e+01 : f32
    %15 = vector.broadcast %cst_15 : f32 to vector<1x128xf32>
    %16 = arith.divf %14, %15 : vector<1x128xf32>
    %17 = arith.mulf %8, %8 : vector<56x128xf32>
    %cst_16 = arith.constant dense<0.000000e+00> : vector<128xf32>
    %18 = vector.multi_reduction <add>, %17, %cst_16 [0] : vector<56x128xf32> to vector<128xf32>
    %19 = vector.shape_cast %18 : vector<128xf32> to vector<1x128xf32>
    %cst_17 = arith.constant 5.600000e+01 : f32
    %20 = vector.broadcast %cst_17 : f32 to vector<1x128xf32>
    %21 = arith.divf %19, %20 : vector<1x128xf32>
    %22 = arith.mulf %16, %16 : vector<1x128xf32>
    %23 = arith.subf %21, %22 : vector<1x128xf32>
    %cst_18 = arith.constant 0.000000e+00 : f32
    %24 = vector.broadcast %cst_18 : f32 to vector<1x128xf32>
    %25 = arith.maximumf %23, %24 : vector<1x128xf32>
    %26 = vector.broadcast %16 : vector<1x128xf32> to vector<56x128xf32>
    %27 = arith.subf %8, %26 : vector<56x128xf32>
    %cst_19 = arith.constant 9.99999974E-6 : f32
    %28 = vector.broadcast %cst_19 : f32 to vector<1x128xf32>
    %29 = arith.addf %25, %28 : vector<1x128xf32>
    %30 = math.rsqrt %29 : vector<1x128xf32>
    %31 = vector.broadcast %30 : vector<1x128xf32> to vector<56x128xf32>
    %32 = arith.mulf %27, %31 : vector<56x128xf32>
    %33 = vector.broadcast %10 : vector<1x128xf32> to vector<56x128xf32>
    %34 = arith.mulf %32, %33 : vector<56x128xf32>
    %35 = vector.broadcast %12 : vector<1x128xf32> to vector<56x128xf32>
    %36 = arith.addf %34, %35 : vector<56x128xf32>
    %cst_20 = arith.constant 0.000000e+00 : f32
    %37 = vector.broadcast %cst_20 : f32 to vector<56x128xf32>
    %38 = arith.maximumf %36, %37 : vector<56x128xf32>
    %39 = vector.shape_cast %38 : vector<56x128xf32> to vector<14x4x128xf32>
    %40 = vector.extract_strided_slice %39 {offsets = [0, 0, 0], sizes = [14, 2, 128], strides = [1, 1, 1]} : vector<14x4x128xf32> to vector<14x2x128xf32>
    %41 = vector.extract_strided_slice %39 {offsets = [0, 2, 0], sizes = [14, 2, 128], strides = [1, 1, 1]} : vector<14x4x128xf32> to vector<14x2x128xf32>
    %42 = arith.maximumf %40, %41 : vector<14x2x128xf32>
    %43 = vector.shape_cast %42 : vector<14x2x128xf32> to vector<28x128xf32>
    %c0_21 = arith.constant 0 : index
    %c0_22 = arith.constant 0 : index
    %44 = vector.load %arg12[%c0_21, %c0_22] : memref<28x128xf32, #tpu.memory_space<vmem>>, vector<28x128xf32>
    tpu.vector_store %arg12[%c0_21, %c0_22], %43 {strides = array<i32>} : memref<28x128xf32, #tpu.memory_space<vmem>>, vector<28x128xf32>,
    %cst_23 = arith.constant 0.000000e+00 : f32
    %45 = vector.broadcast %cst_23 : f32 to vector<20x128xf32>
    %c0_24 = arith.constant 0 : index
    %c0_25 = arith.constant 0 : index
    %46 = vector.load %arg12[%c0_24, %c0_25] : memref<28x128xf32, #tpu.memory_space<vmem>>, vector<20x128xf32>
    %47 = arith.truncf %46 : vector<20x128xf32> to vector<20x128xbf16>
    %c0_26 = arith.constant 0 : index
    %c0_27 = arith.constant 0 : index
    %c0_28 = arith.constant 0 : index
    %c0_29 = arith.constant 0 : index
    %48 = vector.load %arg5[%c0_26, %c0_27, %c0_28, %c0_29] : memref<1x5x128x128xbf16, #tpu.memory_space<vmem>>, vector<1x1x128x128xbf16>
    %49 = vector.shape_cast %48 : vector<1x1x128x128xbf16> to vector<128x128xbf16>
    %cst_30 = arith.constant dense<0.000000e+00> : vector<20x128xf32>
    %50 = tpu.matmul %47, %49, %cst_30 {dimension_numbers = #tpu.dot_dimension_numbers<[1], [0], [0], [1], [0, 0, 1, 1], [], []>} : vector<20x128xbf16>, vector<128x128xbf16>, vector<20x128xf32> -> vector<20x128xf32>
    %51 = arith.addf %45, %50 : vector<20x128xf32>
    %c2_31 = arith.constant 2 : index
    %c0_32 = arith.constant 0 : index
    %52 = vector.load %arg12[%c2_31, %c0_32] : memref<28x128xf32, #tpu.memory_space<vmem>>, vector<20x128xf32>
    %53 = arith.truncf %52 : vector<20x128xf32> to vector<20x128xbf16>
    %c0_33 = arith.constant 0 : index
    %c1 = arith.constant 1 : index
    %c0_34 = arith.constant 0 : index
    %c0_35 = arith.constant 0 : index
    %54 = vector.load %arg5[%c0_33, %c1, %c0_34, %c0_35] : memref<1x5x128x128xbf16, #tpu.memory_space<vmem>>, vector<1x1x128x128xbf16>
    %55 = vector.shape_cast %54 : vector<1x1x128x128xbf16> to vector<128x128xbf16>
    %cst_36 = arith.constant dense<0.000000e+00> : vector<20x128xf32>
    %56 = tpu.matmul %53, %55, %cst_36 {dimension_numbers = #tpu.dot_dimension_numbers<[1], [0], [0], [1], [0, 0, 1, 1], [], []>} : vector<20x128xbf16>, vector<128x128xbf16>, vector<20x128xf32> -> vector<20x128xf32>
    %57 = arith.addf %51, %56 : vector<20x128xf32>
    %c4_37 = arith.constant 4 : index
    %c0_38 = arith.constant 0 : index
    %58 = vector.load %arg12[%c4_37, %c0_38] : memref<28x128xf32, #tpu.memory_space<vmem>>, vector<20x128xf32>
    %59 = arith.truncf %58 : vector<20x128xf32> to vector<20x128xbf16>
    %c0_39 = arith.constant 0 : index
    %c2_40 = arith.constant 2 : index
    %c0_41 = arith.constant 0 : index
    %c0_42 = arith.constant 0 : index
    %60 = vector.load %arg5[%c0_39, %c2_40, %c0_41, %c0_42] : memref<1x5x128x128xbf16, #tpu.memory_space<vmem>>, vector<1x1x128x128xbf16>
    %61 = vector.shape_cast %60 : vector<1x1x128x128xbf16> to vector<128x128xbf16>
    %cst_43 = arith.constant dense<0.000000e+00> : vector<20x128xf32>
    %62 = tpu.matmul %59, %61, %cst_43 {dimension_numbers = #tpu.dot_dimension_numbers<[1], [0], [0], [1], [0, 0, 1, 1], [], []>} : vector<20x128xbf16>, vector<128x128xbf16>, vector<20x128xf32> -> vector<20x128xf32>
    %63 = arith.addf %57, %62 : vector<20x128xf32>
    %c6_44 = arith.constant 6 : index
    %c0_45 = arith.constant 0 : index
    %64 = vector.load %arg12[%c6_44, %c0_45] : memref<28x128xf32, #tpu.memory_space<vmem>>, vector<20x128xf32>
    %65 = arith.truncf %64 : vector<20x128xf32> to vector<20x128xbf16>
    %c0_46 = arith.constant 0 : index
    %c3 = arith.constant 3 : index
    %c0_47 = arith.constant 0 : index
    %c0_48 = arith.constant 0 : index
    %66 = vector.load %arg5[%c0_46, %c3, %c0_47, %c0_48] : memref<1x5x128x128xbf16, #tpu.memory_space<vmem>>, vector<1x1x128x128xbf16>
    %67 = vector.shape_cast %66 : vector<1x1x128x128xbf16> to vector<128x128xbf16>
    %cst_49 = arith.constant dense<0.000000e+00> : vector<20x128xf32>
    %68 = tpu.matmul %65, %67, %cst_49 {dimension_numbers = #tpu.dot_dimension_numbers<[1], [0], [0], [1], [0, 0, 1, 1], [], []>} : vector<20x128xbf16>, vector<128x128xbf16>, vector<20x128xf32> -> vector<20x128xf32>
    %69 = arith.addf %63, %68 : vector<20x128xf32>
    %c8_50 = arith.constant 8 : index
    %c0_51 = arith.constant 0 : index
    %70 = vector.load %arg12[%c8_50, %c0_51] : memref<28x128xf32, #tpu.memory_space<vmem>>, vector<20x128xf32>
    %71 = arith.truncf %70 : vector<20x128xf32> to vector<20x128xbf16>
    %c0_52 = arith.constant 0 : index
    %c4_53 = arith.constant 4 : index
    %c0_54 = arith.constant 0 : index
    %c0_55 = arith.constant 0 : index
    %72 = vector.load %arg5[%c0_52, %c4_53, %c0_54, %c0_55] : memref<1x5x128x128xbf16, #tpu.memory_space<vmem>>, vector<1x1x128x128xbf16>
    %73 = vector.shape_cast %72 : vector<1x1x128x128xbf16> to vector<128x128xbf16>
    %cst_56 = arith.constant dense<0.000000e+00> : vector<20x128xf32>
    %74 = tpu.matmul %71, %73, %cst_56 {dimension_numbers = #tpu.dot_dimension_numbers<[1], [0], [0], [1], [0, 0, 1, 1], [], []>} : vector<20x128xbf16>, vector<128x128xbf16>, vector<20x128xf32> -> vector<20x128xf32>
    %75 = arith.addf %69, %74 : vector<20x128xf32>
    %c0_57 = arith.constant 0 : index
    %c0_58 = arith.constant 0 : index
    %c0_59 = arith.constant 0 : index
    %76 = vector.load %arg6[%c0_57, %c0_58, %c0_59] : memref<1x1x128xf32, #tpu.memory_space<vmem>>, vector<1x1x128xf32>
    %77 = vector.shape_cast %76 : vector<1x1x128xf32> to vector<1x128xf32>
    %c0_60 = arith.constant 0 : index
    %c0_61 = arith.constant 0 : index
    %c0_62 = arith.constant 0 : index
    %78 = vector.load %arg7[%c0_60, %c0_61, %c0_62] : memref<1x1x128xf32, #tpu.memory_space<vmem>>, vector<1x1x128xf32>
    %79 = vector.shape_cast %78 : vector<1x1x128xf32> to vector<1x128xf32>
    %cst_63 = arith.constant dense<0.000000e+00> : vector<128xf32>
    %80 = vector.multi_reduction <add>, %75, %cst_63 [0] : vector<20x128xf32> to vector<128xf32>
    %81 = vector.shape_cast %80 : vector<128xf32> to vector<1x128xf32>
    %cst_64 = arith.constant 2.000000e+01 : f32
    %82 = vector.broadcast %cst_64 : f32 to vector<1x128xf32>
    %83 = arith.divf %81, %82 : vector<1x128xf32>
    %84 = arith.mulf %75, %75 : vector<20x128xf32>
    %cst_65 = arith.constant dense<0.000000e+00> : vector<128xf32>
    %85 = vector.multi_reduction <add>, %84, %cst_65 [0] : vector<20x128xf32> to vector<128xf32>
    %86 = vector.shape_cast %85 : vector<128xf32> to vector<1x128xf32>
    %cst_66 = arith.constant 2.000000e+01 : f32
    %87 = vector.broadcast %cst_66 : f32 to vector<1x128xf32>
    %88 = arith.divf %86, %87 : vector<1x128xf32>
    %89 = arith.mulf %83, %83 : vector<1x128xf32>
    %90 = arith.subf %88, %89 : vector<1x128xf32>
    %cst_67 = arith.constant 0.000000e+00 : f32
    %91 = vector.broadcast %cst_67 : f32 to vector<1x128xf32>
    %92 = arith.maximumf %90, %91 : vector<1x128xf32>
    %93 = vector.broadcast %83 : vector<1x128xf32> to vector<20x128xf32>
    %94 = arith.subf %75, %93 : vector<20x128xf32>
    %cst_68 = arith.constant 9.99999974E-6 : f32
    %95 = vector.broadcast %cst_68 : f32 to vector<1x128xf32>
    %96 = arith.addf %92, %95 : vector<1x128xf32>
    %97 = math.rsqrt %96 : vector<1x128xf32>
    %98 = vector.broadcast %97 : vector<1x128xf32> to vector<20x128xf32>
    %99 = arith.mulf %94, %98 : vector<20x128xf32>
    %100 = vector.broadcast %77 : vector<1x128xf32> to vector<20x128xf32>
    %101 = arith.mulf %99, %100 : vector<20x128xf32>
    %102 = vector.broadcast %79 : vector<1x128xf32> to vector<20x128xf32>
    %103 = arith.addf %101, %102 : vector<20x128xf32>
    %cst_69 = arith.constant 0.000000e+00 : f32
    %104 = vector.broadcast %cst_69 : f32 to vector<20x128xf32>
    %105 = arith.maximumf %103, %104 : vector<20x128xf32>
    %106 = vector.shape_cast %105 : vector<20x128xf32> to vector<5x4x128xf32>
    %107 = vector.extract_strided_slice %106 {offsets = [0, 0, 0], sizes = [5, 2, 128], strides = [1, 1, 1]} : vector<5x4x128xf32> to vector<5x2x128xf32>
    %108 = vector.extract_strided_slice %106 {offsets = [0, 2, 0], sizes = [5, 2, 128], strides = [1, 1, 1]} : vector<5x4x128xf32> to vector<5x2x128xf32>
    %109 = arith.maximumf %107, %108 : vector<5x2x128xf32>
    %110 = vector.shape_cast %109 : vector<5x2x128xf32> to vector<10x128xf32>
    %111 = vector.shape_cast %110 : vector<10x128xf32> to vector<5x2x128xf32>
    %c0_70 = arith.constant 0 : index
    %c0_71 = arith.constant 0 : index
    %c0_72 = arith.constant 0 : index
    %c0_73 = arith.constant 0 : index
    %112 = vector.load %arg10[%c0_70, %c0_71, %c0_72, %c0_73] : memref<1x5x2x128xf32, #tpu.memory_space<vmem>>, vector<1x5x2x128xf32>
    %113 = vector.shape_cast %112 : vector<1x5x2x128xf32> to vector<5x2x128xf32>
    %114 = vector.shape_cast %111 : vector<5x2x128xf32> to vector<1x5x2x128xf32>
    tpu.vector_store %arg10[%c0_70, %c0_71, %c0_72, %c0_73], %114 {strides = array<i32>} : memref<1x5x2x128xf32, #tpu.memory_space<vmem>>, vector<1x5x2x128xf32>,
    %115 = arith.truncf %110 : vector<10x128xf32> to vector<10x128xbf16>
    %c0_74 = arith.constant 0 : index
    %c0_75 = arith.constant 0 : index
    %c0_76 = arith.constant 0 : index
    %116 = vector.load %arg8[%c0_74, %c0_75, %c0_76] : memref<1x128x128xbf16, #tpu.memory_space<vmem>>, vector<1x128x128xbf16>
    %117 = vector.shape_cast %116 : vector<1x128x128xbf16> to vector<128x128xbf16>
    %cst_77 = arith.constant dense<0.000000e+00> : vector<10x128xf32>
    %118 = tpu.matmul %115, %117, %cst_77 {dimension_numbers = #tpu.dot_dimension_numbers<[1], [0], [0], [1], [0, 0, 1, 1], [], []>} : vector<10x128xbf16>, vector<128x128xbf16>, vector<10x128xf32> -> vector<10x128xf32>
    %c0_78 = arith.constant 0 : index
    %c0_79 = arith.constant 0 : index
    %c0_80 = arith.constant 0 : index
    %119 = vector.load %arg9[%c0_78, %c0_79, %c0_80] : memref<1x1x128xf32, #tpu.memory_space<vmem>>, vector<1x1x128xf32>
    %120 = vector.shape_cast %119 : vector<1x1x128xf32> to vector<1x128xf32>
    %121 = vector.broadcast %120 : vector<1x128xf32> to vector<10x128xf32>
    %122 = arith.addf %118, %121 : vector<10x128xf32>
    %123 = vector.shape_cast %122 : vector<10x128xf32> to vector<5x2x128xf32>
    %c0_81 = arith.constant 0 : index
    %c0_82 = arith.constant 0 : index
    %c0_83 = arith.constant 0 : index
    %c0_84 = arith.constant 0 : index
    %124 = vector.load %arg11[%c0_81, %c0_82, %c0_83, %c0_84] : memref<1x5x2x128xf32, #tpu.memory_space<vmem>>, vector<1x5x2x128xf32>
    %125 = vector.shape_cast %124 : vector<1x5x2x128xf32> to vector<5x2x128xf32>
    %126 = vector.shape_cast %123 : vector<5x2x128xf32> to vector<1x5x2x128xf32>
    tpu.vector_store %arg11[%c0_81, %c0_82, %c0_83, %c0_84], %126 {strides = array<i32>} : memref<1x5x2x128xf32, #tpu.memory_space<vmem>>, vector<1x5x2x128xf32>,
    return
  }
  func.func @transform_0(%arg0: i32) -> (i32, i32) {
    %c0_i32 = arith.constant 0 : i32
    %c0_i32_0 = arith.constant 0 : i32
    %c0_i32_1 = arith.constant 0 : i32
    return %c0_i32, %c0_i32_0 : i32, i32
  }
  func.func @transform_1(%arg0: i32) -> (i32, i32, i32) {
    %c0_i32 = arith.constant 0 : i32
    %c0_i32_0 = arith.constant 0 : i32
    %c0_i32_1 = arith.constant 0 : i32
    return %arg0, %c0_i32, %c0_i32_0 : i32, i32, i32
  }
  func.func @transform_2(%arg0: i32) -> (i32, i32, i32) {
    %c0_i32 = arith.constant 0 : i32
    %c0_i32_0 = arith.constant 0 : i32
    %c0_i32_1 = arith.constant 0 : i32
    return %arg0, %c0_i32, %c0_i32_0 : i32, i32, i32
  }
  func.func @transform_3(%arg0: i32) -> (i32, i32, i32) {
    %c0_i32 = arith.constant 0 : i32
    %c0_i32_0 = arith.constant 0 : i32
    %c0_i32_1 = arith.constant 0 : i32
    return %arg0, %c0_i32, %c0_i32_0 : i32, i32, i32
  }
  func.func @transform_4(%arg0: i32) -> (i32, i32, i32, i32) {
    %c0_i32 = arith.constant 0 : i32
    %c0_i32_0 = arith.constant 0 : i32
    %c0_i32_1 = arith.constant 0 : i32
    %c0_i32_2 = arith.constant 0 : i32
    return %arg0, %c0_i32, %c0_i32_0, %c0_i32_1 : i32, i32, i32, i32
  }
  func.func @transform_5(%arg0: i32) -> (i32, i32, i32) {
    %c0_i32 = arith.constant 0 : i32
    %c0_i32_0 = arith.constant 0 : i32
    %c0_i32_1 = arith.constant 0 : i32
    return %arg0, %c0_i32, %c0_i32_0 : i32, i32, i32
  }
  func.func @transform_6(%arg0: i32) -> (i32, i32, i32) {
    %c0_i32 = arith.constant 0 : i32
    %c0_i32_0 = arith.constant 0 : i32
    %c0_i32_1 = arith.constant 0 : i32
    return %arg0, %c0_i32, %c0_i32_0 : i32, i32, i32
  }
  func.func @transform_7(%arg0: i32) -> (i32, i32, i32) {
    %c0_i32 = arith.constant 0 : i32
    %c0_i32_0 = arith.constant 0 : i32
    %c0_i32_1 = arith.constant 0 : i32
    return %arg0, %c0_i32, %c0_i32_0 : i32, i32, i32
  }
  func.func @transform_8(%arg0: i32) -> (i32, i32, i32) {
    %c0_i32 = arith.constant 0 : i32
    %c0_i32_0 = arith.constant 0 : i32
    %c0_i32_1 = arith.constant 0 : i32
    return %arg0, %c0_i32, %c0_i32_0 : i32, i32, i32
  }
  func.func @transform_9(%arg0: i32) -> (i32, i32, i32, i32) {
    %c0_i32 = arith.constant 0 : i32
    %c0_i32_0 = arith.constant 0 : i32
    %c0_i32_1 = arith.constant 0 : i32
    %c0_i32_2 = arith.constant 0 : i32
    return %arg0, %c0_i32, %c0_i32_0, %c0_i32_1 : i32, i32, i32, i32
  }
  func.func @transform_10(%arg0: i32) -> (i32, i32, i32, i32) {
    %c0_i32 = arith.constant 0 : i32
    %c0_i32_0 = arith.constant 0 : i32
    %c0_i32_1 = arith.constant 0 : i32
    %c0_i32_2 = arith.constant 0 : i32
    return %arg0, %c0_i32, %c0_i32_0, %c0_i32_1 : i32, i32, i32, i32
  }
}

</mosaic_0001>

<bundles_post_ra>
// kernel: _run_fused.1
= control target key start
LH: loop header
LB: loop body
LE: loop exit
PB: predicated region body
PF: predicated region fallthrough
CT: control target
= control target key end

     0   :  { %s3117_s0 = inlined_call_operand.vmem [shape: bf16[64,16], index: 0, kind: input, shape index: {}]   ;;  %s3118_s1 = inlined_call_operand.hbm [shape: bf16[3,80,128], index: 1, kind: input, shape index: {}]   ;;  %s3119_s2 = inlined_call_operand.vmem [shape: f32[3,1,128], index: 2, kind: input, shape index: {}]   ;;  %s3120_s3 = inlined_call_operand.vmem [shape: f32[3,1,128], index: 3, kind: input, shape index: {}]   ;;  %s3121_s4 = inlined_call_operand.hbm [shape: bf16[3,5,128,128], index: 4, kind: input, shape index: {}]   ;;  %s3122_s5 = inlined_call_operand.vmem [shape: f32[3,1,128], index: 5, kind: input, shape index: {}]   ;;  %s3123_s6 = inlined_call_operand.vmem [shape: f32[3,1,128], index: 6, kind: input, shape index: {}]   ;;  %s3124_s7 = inlined_call_operand.hbm [shape: bf16[3,128,128], index: 7, kind: input, shape index: {}]   ;;  %s3125_s8 = inlined_call_operand.vmem [shape: f32[3,1,128], index: 8, kind: input, shape index: {}]   ;;  %s3126_s9 = inlined_call_operand.hbm [shape: f32[3,5,2,128], index: 9, kind: output, shape index: {0}]   ;;  %s3127_s10 = inlined_call_operand.hbm [shape: f32[3,5,2,128], index: 10, kind: output, shape index: {1}]  }
   0x1   :  { %3140 = sst [smem:[#allocation22_spill]] %s3121_s4 }
   0x2   :  { %3141 = sst [smem:[#allocation23_spill]] %s3123_s6 }
   0x3   :  { %3142 = sst [smem:[#allocation24_spill]] %s3125_s8 }
   0x4   :  { %3143 = sst [smem:[#allocation25_spill]] %s3126_s9 }
   0x5   :  { %3144 = sst [smem:[#allocation26_spill]] %s3127_s10 }
   0x6   :  { %16 = vsyncpa [#allocation4], 0 }
   0x7   :  { %18 = vsyncpa [#allocation4 + $0x1], 0 }
   0x8   :  { %19 = vsyncpa [#allocation7], 0 }
   0x9   :  { %21 = vsyncpa [#allocation7 + $0x1], 0 }
   0xa   :  { %22 = vsyncpa [#allocation5], 0 }
   0xb   :  { %24 = vsyncpa [#allocation5 + $0x1], 0 }
   0xc   :  { %25 = vsyncpa [#allocation11], 0 }
   0xd   :  { %27 = vsyncpa [#allocation11 + $0x1], 0  ;;  %s2624_s13 = smov 0   ;;  %s2626_s14 = smov 0  }
   0xe   :  { %s2628_s15 = smov 0   ;;  %s2630_s16 = smov 0  }
   0xf LB: > { %3145 = sst [smem:[#allocation16_spill]] %s2546_s13  ;;  %s2645_s17 = sadd.s32 4294967295, %s2558_s16   ;;  %s2558_s16 = sphi %s2630_s16, %s3165_s16   ;;  %s2554_s15 = sphi %s2628_s15, %s3167_s15   ;;  %s2550_s14 = sphi %s2626_s14, %s3169_s14   ;;  %s2546_s13 = sphi %s2624_s13, %s3168_s13  }
  0x10   : > { %3146 = sst [smem:[#allocation17_spill]] %s2554_s15  ;;  %s1886_s18 = sadd.s32 4294967294, %s2558_s16  }
  0x11   : > { %s2649_s19 = sadd.s32 1, %s2558_s16   ;;  %s61_s20 = sadd.s32 1, %s2554_s15 }
  0x12   : > { %3147 = sst [smem:[#allocation18_spill]] %s2649_s19  ;;  %s58_s21 = ssub.s32 %s2558_s16, %s2649_s19 }
  0x13   : > { %p68_p0 = scmp.ne.s32.totalorder %s2554_s15, %s2550_s14  ;;  %p59_p1 = scmp.eq.s32.totalorder %s58_s21, 0 }
  0x14   : > { %p69_p2 = scmp.eq.s32.totalorder %s2558_s16, 0  ;;  %p74_p3 = scmp.ne.s32.totalorder %s2550_s14, %s2546_s13 }
  0x15   : > { %p75_p4 = scmp.eq.s32.totalorder %s2645_s17, 0  ;;  %p280_p7 = scmp.eq.s32.totalorder %s2645_s17, 2 }
  0x16   : > { %s2661_s22 = scalar_select %p59_p1, %s2554_s15, %s61_s20  }
  0x17   : > { %p70_p5 = por %p69_p2, %p68_p0  ;;  %p2663_p6 = por %p75_p4, %p74_p3 }
  0x18   : > { %3148 = sst [smem:[#allocation19_spill]] %s2661_s22  ;;  %p286_p8 = scmp.eq.s32.totalorder %s1886_s18, 2 }
  0x19   : > { %p2310_p9 = scmp.lt.s32.totalorder %s2558_s16, 3  ;;  %p2669_p10 = por %p280_p7, %p68_p0 }
  0x1a   : > { %p2673_p11 = por %p286_p8, %p74_p3  ;;  %s2678_s26 = sand.u32 1, %s2554_s15  }
  0x1b   : > { %s3150_s24 = scalar_select %p2669_p10, 1, 0 }
  0x1c   : > { %s3152_s25 = scalar_select %p2673_p11, 1, 0 }
  0x1d   : > { %3151 = sst [smem:[#allocation20_spill]] %s3150_s24  ;;  %p2680_p12 = pnand %p2310_p9, %p70_p5 }
  0x1e   : > { %3153 = sst [smem:[#allocation21_spill]] %s3152_s25  ;;  %s369_s28 = sand.u32 1, %s2558_s16  }
  0x1f   : > { %s2276_s29 = smul.u32 320, %s2678_s26  ;;  %p1894_p13 = scmp.ge.s32.totalorder %s2558_s16, 1 }
  0x20   : > { %s2277_s30 = smul.u32 320, %s2558_s16  ;;  %p429_p0 = scmp.lt.s32.totalorder %s2558_s16, 4 }
  0x21   : > { %s3155_s4 = sld [smem:[#allocation22_spill]]  ;;  %s373_s20 = scalar_lea.vmem [#allocation6], %s2276_s29 }
  0x22   : > { %s381_s21 = sshll.u32 %s373_s20, 4  ;;  %p2692_p1 = pnand %p1894_p13, %p429_p0  ;;  %s382_s21 = int_to_ptr.vmem [resolvable:$true] %s381_s21 }
  0x23   : > { %s2696_s19 = scalar_lea.sflag [#allocation7], %s369_s28  ;;  %p2370_p3 = pneg %p2680_p12 }
  0x27   : > { %s378_s18 = scalar_lea.hbm %s3155_s4, %s2277_s30  ;;  %s2373_s11 = scalar_lea.hbm %s3155_s4, 960 }
  0x28   : > { %s379_s22 = sshll.u32 %s378_s18, 4  ;;  %s380_s22 = int_to_ptr.hbm [resolvable:$true] %s379_s22 }
  0x29   : > { %s2366_s25 = sshra.s32 %s380_s22, 4  ;;  %s2367_s25 = int_to_ptr.hbm [resolvable:$true] %s2366_s25 }
  0x2a   : > { %s2368_s13 = scalar_lea.hbm %s2367_s25, 320  ;;  %p2374_p7 = scmp.lt.s32.totalorder %s2367_s25, %s3155_s4 }
  0x2b   : > { %p2369_p2 = scmp.ne.s32.totalorder %s2367_s25, %s2368_s13  ;;  %p2375_p8 = scmp.lt.s32.totalorder %s2373_s11, %s2368_s13 }
  0x2d   : > { %p2371_p4 = pnand %p2370_p3, %p2369_p2  ;;  %p2376_p9 = por %p2375_p8, %p2374_p7 }
  0x2f   : > { %p2372_p5 = pneg %p2371_p4 }
  0x31   : > { %p2377_p13 = pnand %p2376_p9, %p2372_p5 }
  0x33   : > { %2380 = shalt.err (!%p2377_p13)
}
  0x34   : > { %s2560_s28 = smov 64   ;;  %s2561_s20 = smov 4  }
  0x35   : > { %2299 = dma.hbm_to_vmem [thread:$0]  (!%p2680_p12), %s380_s22, 5120, %s382_s21, %s2696_s19, %s2560_s28, %s2560_s28, %s2561_s20  }
  0x36   : > { %s2274_s25 = smul.u32 40, %s2678_s26  ;;  %s1891_s29 = sshll.u32 %s2678_s26, 6 }
  0x37   : > { %s2275_s13 = smul.u32 40, %s2558_s16  ;;  %s2199_s9 = sshll.u32 %s2558_s16, 6 }
  0x38   : > { %s339_s18 = scalar_lea.vmem [#allocation3], %s2274_s25  ;;  %s336_s24 = scalar_lea.sflag [#allocation4], %s2678_s26 }
  0x39   : > { %s344_s12 = scalar_lea.hbm %s3118_s1, %s2275_s13  ;;  %s347_s4 = sshll.u32 %s339_s18, 4  ;;  %s348_s4 = int_to_ptr.vmem [resolvable:$true] %s347_s4 }
  0x3a   : > { %s345_s10 = sshll.u32 %s344_s12, 4  ;;  %s2403_s30 = scalar_lea.hbm %s3118_s1, 120  ;;  %s346_s10 = int_to_ptr.hbm [resolvable:$true] %s345_s10 }
  0x3b   : > { %s2396_s8 = sshra.s32 %s346_s10, 4  ;;  %s2397_s8 = int_to_ptr.hbm [resolvable:$true] %s2396_s8 }
  0x3c   : > { %s2398_s6 = scalar_lea.hbm %s2397_s8, 40  ;;  %p2404_p5 = scmp.lt.s32.totalorder %s2397_s8, %s3118_s1 }
  0x3d   : > { %p2399_p0 = scmp.ne.s32.totalorder %s2397_s8, %s2398_s6  ;;  %p2405_p7 = scmp.lt.s32.totalorder %s2403_s30, %s2398_s6 }
  0x3f   : > { %p2401_p2 = pnand %p2399_p0, %p2370_p3  ;;  %p2406_p8 = por %p2405_p7, %p2404_p5 }
  0x41   : > { %p2402_p4 = pneg %p2401_p2 }
  0x43   : > { %p2407_p9 = pnand %p2406_p8, %p2402_p4 }
  0x45   : > { %2410 = shalt.err (!%p2407_p9)
}
  0x46   : > { %2296 = dma.hbm_to_vmem [thread:$0]  (!%p2680_p12), %s346_s10, 640, %s348_s4, %s336_s24, %s2560_s28, %s2560_s28, %s2561_s20  }
  0x47   : > { %s412_s12 = scalar_lea.hbm %s3124_s7, %s2199_s9  ;;  %s407_s18 = scalar_lea.vmem [#allocation8], %s1891_s29 }
  0x48   : > { %s415_s22 = sshll.u32 %s407_s18, 4  ;;  %s413_s21 = sshll.u32 %s412_s12, 4  ;;  %s416_s22 = int_to_ptr.vmem [resolvable:$true] %s415_s22  ;;  %s414_s21 = int_to_ptr.hbm [resolvable:$true] %s413_s21 }
  0x49   : > { %s2426_s6 = sshra.s32 %s414_s21, 4  ;;  %s2433_s4 = scalar_lea.hbm %s3124_s7, 192  ;;  %s2427_s6 = int_to_ptr.hbm [resolvable:$true] %s2426_s6 }
  0x4a   : > { %s2428_s8 = scalar_lea.hbm %s2427_s6, 64  ;;  %p2434_p4 = scmp.lt.s32.totalorder %s2427_s6, %s3124_s7 }
  0x4b   : > { %p2429_p13 = scmp.ne.s32.totalorder %s2427_s6, %s2428_s8  ;;  %p2435_p5 = scmp.lt.s32.totalorder %s2433_s4, %s2428_s8 }
  0x4d   : > { %p2431_p0 = pnand %p2429_p13, %p2370_p3  ;;  %p2436_p7 = por %p2435_p5, %p2434_p4 }
  0x4f   : > { %p2432_p2 = pneg %p2431_p0 }
  0x51   : > { %p2437_p8 = pnand %p2436_p7, %p2432_p2 }
  0x53   : > { %2440 = shalt.err (!%p2437_p8)
}
  0x54   : > { %2302 = dma.hbm_to_vmem [thread:$0]  (!%p2680_p12), %s414_s21, 1024, %s416_s22, %s2696_s19, %s2560_s28, %s2560_s28, %s2561_s20  }
  0x55   : > { %433 = sbr.rel (%p2692_p1) target bundleno = 882 (0x372), region = 56  ;;  %s2758_s9 = sand.u32 (!%p2692_p1), 1, %s2550_s14  }
  0x56   : > { %s2278_s29 = smul.u32 (!%p2692_p1), 40, %s2758_s9  ;;  %s436_s25 = scalar_lea.sflag (!%p2692_p1), [#allocation4], %s2758_s9 }
  0x58   : > { %s2762_s26 = scalar_lea.vmem (!%p2692_p1), [#allocation3], %s2278_s29 }
  0x5a   : > { %2529 = dma.done.wait (%p2663_p6), %s436_s25, 640  }
  0x5b   : > { %2531 = vsyncadd (%p2663_p6), %s436_s25, 4294966656  ;;  %s445_s15 = sand.u32 1, %s2645_s17   ;;  %s2279_s19 = smul.u32 320, %s2758_s9 }
  0x5c   : > { %s446_s27 = scalar_lea.sflag [#allocation7], %s445_s15 }
  0x5d   : > { %s2770_s28 = scalar_lea.vmem [#allocation6], %s2279_s19 }
  0x5e   : > { %2533 = dma.done.wait (%p2663_p6), %s446_s27, 6144  }
  0x5f   : > { %2535 = vsyncadd (%p2663_p6), %s446_s27, 4294961152  ;;  %v2779_v0 = vld [vmem:[%s3117_s0] sm:$0xff]   ;;  %v2784_v1 = vld [vmem:[%s3117_s0 + $0x8] sm:$0xff]   ;;  %vm581_vm0 = vcmask 1046528   ;;  %vm625_vm1 = vcmask 1044480   ;;  %s2562_s10 = smov 16  }
  0x60   : > { %v550_v2 = vld [vmem:[%s3117_s0] sm:$0xe]  ;;  %v2256_v3 = vunpack.c.h.b16 %v2779_v0  ;;  %v2799_v9 = vld [vmem:[%s3117_s0 + $0x10] sm:$0xff]   ;;  %v583_v11 = vrot.slane %v2784_v1, 1  ;;  %v627_v14 = vrot.slane %v2784_v1, 3  ;;  %v605_v22 = vrot.slane %v2784_v1, 2 }
  0x61   : > { %v577_v4 = vunpack.c.l.b16 %v550_v2  ;;  %v554_v5 = vld [vmem:[%s3117_s0] sm:$0x8]  ;;  %v585_v12 = vrot.slane %v2799_v9, 1  ;;  %v551_v19 = vld [vmem:[%s3117_s0 + $0x1c] sm:$0x1]  ;;  %s2563_s19 = smov 48   ;;  %v2259_v25 = vunpack.c.l.b16 %v2784_v1  ;;  %v2264_v46 = vunpack.c.h.b16 %v2799_v9 }
  0x62   : > { %v552_v6 = vld [vmem:[%s3117_s0] sm:$0xc]  ;;  %v621_v7 = vunpack.c.l.b16 %v554_v5  ;;  %v549_v23 = vld [vmem:[%s3117_s0 + $0x18] sm:$0xff]   ;;  %v607_v26 = vrot.slane %v2799_v9, 2  ;;  %v578_v27 = vunpack.c.l.b16 %v551_v19  ;;  %vm603_vm2 = vcmask 1045504   ;;  %s2564_s11 = smov 32  }
  0x63   : > { %v599_v8 = vunpack.c.l.b16 %v552_v6  ;;  %v579_v10 = vpack.c.b16 %v2256_v3, %v577_v4  ;;  %v586_v17 = vsel %vm581_vm0, %v583_v11, %v585_v12  ;;  %v2819_v28 = vunpack.c.l.b16 %v549_v23  ;;  %v553_v33 = vld [vmem:[%s3117_s0 + $0x1c] sm:$0x3]  ;;  %v2204_v35 = vld [vmem:[%s2762_s26 + $0x20] sm:$0xff]  ;;  %s2565_s22 = smov 64   ;;  %v2203_v40 = vld [vmem:[%s2762_s26 + $0x18] sm:$0xff]  ;;  %p527_p6 = scmp.lt.s32.totalorder %s2645_s17, 2 }
  0x64   : > { %v623_v13 = vpack.c.b16 %v2256_v3, %v621_v7  ;;  %591 = vrot.lane.b32.xlu2 %v586_v17, %s2562_s10  ;;  %v608_v29 = vsel %vm603_vm2, %v605_v22, %v607_v26  ;;  %v643_v31 = vpack.c.b16 %v2259_v25, %v2256_v3  ;;  %v555_v34 = vld [vmem:[%s3117_s0 + $0x1c] sm:$0x7]  ;;  %v629_v36 = vrot.slane %v2799_v9, 3  ;;  %747 = vmatpush.bf16.msra.mxu0 %v2204_v35  ;;  %v2273_v43 = vld [vmem:[%s3117_s0 + $0xc] sm:$0xff]   ;;  %s3157_s18 = sld [smem:[#allocation23_spill]]  ;;  %s3139_s25 = smul.u32 10, %s2758_s9 }
  0x65   : > { %v582_v15 = vrot.slane %v579_v10, 1  ;;  %v601_v16 = vpack.c.b16 %v2256_v3, %v599_v8  ;;  %v580_v32 = vpack.c.b16 %v578_v27, %v2819_v28  ;;  %v600_v37 = vunpack.c.l.b16 %v553_v33  ;;  %v2202_v54 = vld [vmem:[%s2762_s26 + $0x10] sm:$0xff]  ;;  %v2201_v55 = vld [vmem:[%s2762_s26 + $0x8] sm:$0xff]  ;;  %v2200_v56 = vld [vmem:[%s2762_s26] sm:$0xff]  ;;  %s2884_s26 = scalar_select %p527_p6, %s2645_s17, 2 }
  0x66   : > { %v626_v18 = vrot.slane %v623_v13, 3  ;;  %v622_v39 = vunpack.c.l.b16 %v555_v34  ;;  %v630_v42 = vsel %vm625_vm1, %v627_v14, %v629_v36  ;;  %v645_v49 = vpack.c.b16 %v2819_v28, %v2264_v46  ;;  %s3158_s23 = sld [smem:[#allocation24_spill]]  ;;  %s519_s15 = scalar_lea.vmem [#allocation9], %s3139_s25 }
  0x67   : > { %v584_v20 = vsel %vm581_vm0, %v582_v15, %v583_v11  ;;  %v604_v24 = vrot.slane %v601_v16, 2  ;;  %v587_v38 = vrot.slane %v580_v32, 1  ;;  %v602_v44 = vpack.c.b16 %v600_v37, %v2819_v28  ;;  %s529_s30 = scalar_lea.vmem %s3119_s2, %s2884_s26  ;;  %s535_s27 = scalar_lea.vmem %s3122_s5, %s2884_s26 }
  0x68   : > { %589 = vrot.lane.b32.xlu0 %v584_v20, %s2562_s10  ;;  %v628_v21 = vsel %vm625_vm1, %v626_v18, %v627_v14  ;;  %v624_v45 = vpack.c.b16 %v622_v39, %v2819_v28  ;;  %748 = vmatpush.bf16.msra.mxu0 %v2203_v40  ;;  %v642_v52 = vunpack.c.h.b16 %v549_v23  ;;  %vm655_vm3 = vcmask 130048  }
  0x69   : > { %633 = vrot.lane.b32.xlu1 %v628_v21, %s2563_s19  ;;  %v606_v30 = vsel %vm603_vm2, %v604_v24, %v605_v22  ;;  %v588_v41 = vsel %vm581_vm0, %v585_v12, %v587_v38  ;;  %v609_v47 = vrot.slane %v602_v44, 2  ;;  %vm668_vm4 = vcmask 261120  }
  0x6a   : > { %v631_v48 = vrot.slane %v624_v45, 3  ;;  %v646_v53 = vpack.c.b16 %v642_v52, %v642_v52  ;;  %vm677_vm5 = vcmask 392192   ;;  %vm686_vm6 = vcmask 523264  }
  0x6b   : > { %v610_v50 = vsel %vm603_vm2, %v607_v26, %v609_v47  ;;  %vm735_vm7 = vcmask 654336   ;;  %v574_v18 = vpack.c.b16 %v2819_v28, %v2819_v28  ;;  %vm1444_vm12 = vcmask 1043456  }
  0x6c   : > { %613 = vrot.lane.b32.xlu2 %v608_v29, %s2564_s11  ;;  %v632_v51 = vsel %vm625_vm1, %v629_v36, %v631_v48  ;;  %749 = vmatpush.bf16.msra.mxu0 %v2202_v54  ;;  %s541_s8 = scalar_lea.vmem %s3158_s23, %s2884_s26 }
  0x70   : > { %611 = vrot.lane.b32.xlu0 %v606_v30, %s2564_s11  ;;  %750 = vmatpush.bf16.msra.mxu0 %v2201_v55 }
  0x71   : > { %647 = vrot.lane.b32.xlu1 %v643_v31, %s2565_s22  ;;  %v2566_v31 = vmov 56.0  }
  0x72   : > { %2358 = vrcp.f32 %v2566_v31  ;;  %v2207_v31 = vld [vmem:[%s2770_s28 + $0x10] sm:$0xff] }
  0x74   : > { %593 = vrot.lane.b32.xlu2 %v588_v41, %s2562_s10  ;;  %751 = vmatpush.bf16.msra.mxu0 %v2200_v56 }
  0x78   : > { %635 = vrot.lane.b32.xlu0 %v630_v42, %s2563_s19  ;;  %v2359_v37 = vpop.eup %2358 }
  0x79   : > { %649 = vrot.lane.b32.xlu1 %v2273_v43, %s2565_s22  ;;  %v787_v44 = vmul.f32 56.0, %v2359_v37  ;;  %vm791_vm8 = vweird.f32 %v2359_v37 }
  0x7c   : > { %651 = vrot.lane.b32.xlu2 %v645_v49, %s2565_s22 }
  0x80   : > { %615 = vrot.lane.b32.xlu0 %v610_v50, %s2564_s11 }
  0x81   : > { %637 = vrot.lane.b32.xlu1 %v632_v51, %s2563_s19  ;;  %v788_v51 = vsub.f32 1.0, %v787_v44  ;;  %v2217_v44 = vld [vmem:[%s2770_s28 + $0x60] sm:$0xff] }
  0x84   : > { %639 = vrot.lane.b32.xlu2 %v631_v48, %s2563_s19  ;;  %s2281_s19 = smul.u32 10, %s2645_s17 }
  0x88   : > { %595 = vrot.lane.b32.xlu0 %v587_v38, %s2562_s10  ;;  %s532_s10 = scalar_lea.vmem %s3120_s3, %s2884_s26 }
  0x89   : > { %617 = vrot.lane.b32.xlu1 %v609_v47, %s2564_s11 }
  0x90   : > { %653 = vrot.lane.b32.xlu0 %v646_v53, %s2565_s22  ;;  %s538_s22 = scalar_lea.vmem %s3157_s18, %s2884_s26 }
  0xbe   : > { %v592_v61 = vpop.permute.xlu2 %591 }
  0xbf   : > { %v661_v4 = vsel %vm655_vm3, %v2784_v1, %v592_v61 }
  0xc6   : > { %v614_v5 = vpop.permute.xlu2 %613 }
  0xc7   : > { %v672_v6 = vsel %vm668_vm4, %v661_v4, %v614_v5 }
  0xce   : > { %v594_v11 = vpop.permute.xlu2 %593 }
  0xcf   : > { %v664_v12 = vsel %vm655_vm3, %v2799_v9, %v594_v11 }
  0xd6   : > { %v652_v16 = vpop.permute.xlu2 %651 }
  0xda   : > { %v590_v57 = vpop.permute.xlu0 %589 }
  0xdb   : > { %v634_v58 = vpop.permute.xlu1 %633  ;;  %v658_v59 = vsel %vm655_vm3, %v2779_v0, %v590_v57  ;;  %v789_v57 = vmul.f32 %v2359_v37, %v788_v51 }
  0xde   : > { %v640_v22 = vpop.permute.xlu2 %639 }
  0xe2   : > { %v612_v60 = vpop.permute.xlu0 %611 }
  0xe3   : > { %v670_v62 = vsel %vm668_vm4, %v658_v59, %v612_v60  ;;  %v648_v63 = vpop.permute.xlu1 %647 }
  0xe4   : > { %v679_v2 = vsel %vm677_vm5, %v670_v62, %v634_v58  ;;  %v790_v62 = vadd.f32 %v2359_v37, %v789_v57 }
  0xe5   : > { %v688_v3 = vsel %vm686_vm6, %v679_v2, %v648_v63 }
  0xe6   : > { %1916 = vmatmul.msk.bf16.vlgmr.msra.gmra.mxu0 %vm735_vm7, %v688_v3 }
  0xea   : > { %v636_v0 = vpop.permute.xlu0 %635 }
  0xeb   : > { %v681_v7 = vsel %vm677_vm5, %v672_v6, %v636_v0  ;;  %v650_v8 = vpop.permute.xlu1 %649  ;;  %v792_v6 = vsel %vm791_vm8, %v2359_v37, %v790_v62  ;;  %v2244_v62 = vld [vmem:[%s2770_s28 + $0x138] sm:$0xff] }
  0xec   : > { %v690_v10 = vsel %vm686_vm6, %v681_v7, %v650_v8  ;;  %v2212_v8 = vld [vmem:[%s2770_s28 + $0x38] sm:$0xff] }
  0xed   : > { %1150 = vmatpush.bf16.msra.mxu2 %v2212_v8 }
  0xf2   : > { %v616_v13 = vpop.permute.xlu0 %615 }
  0xf3   : > { %v674_v1 = vsel %vm668_vm4, %v664_v12, %v616_v13  ;;  %v638_v14 = vpop.permute.xlu1 %637 }
  0xf4   : > { %v683_v15 = vsel %vm677_vm5, %v674_v1, %v638_v14  ;;  %v2211_v1 = vld [vmem:[%s2770_s28 + $0x30] sm:$0xff] }
  0xf5   : > { %v692_v17 = vsel %vm686_vm6, %v683_v15, %v652_v16  ;;  %1151 = vmatpush.bf16.msra.mxu2 %v2211_v1  ;;  %v2210_v16 = vld [vmem:[%s2770_s28 + $0x28] sm:$0xff] }
  0xf6   : > { %1917 = vmatmul.msk.bf16.gmra.mxu0 %vm735_vm7, %v690_v10 }
  0xf9   : > { %1152 = vmatpush.bf16.msra.mxu2 %v2210_v16 }
  0xfa   : > { %v596_v19 = vpop.permute.xlu0 %595 }
  0xfb   : > { %v667_v20 = vsel %vm655_vm3, %v574_v18, %v596_v19  ;;  %v618_v21 = vpop.permute.xlu1 %617  ;;  %v2209_v18 = vld [vmem:[%s2770_s28 + $0x20] sm:$0xff]  ;;  %v2220_v19 = vld [vmem:[%s2770_s28 + $0x78] sm:$0xff] }
  0xfc   : > { %v676_v9 = vsel %vm668_vm4, %v667_v20, %v618_v21  ;;  %v2228_v20 = vld [vmem:[%s2770_s28 + $0xb8] sm:$0xff]  ;;  %1084 = vmatpush.bf16.msra.mxu1 %v2220_v19 }
  0xfd   : > { %v685_v23 = vsel %vm677_vm5, %v676_v9, %v640_v22  ;;  %1153 = vmatpush.bf16.msra.mxu2 %v2209_v18  ;;  %v2208_v21 = vld [vmem:[%s2770_s28 + $0x18] sm:$0xff]  ;;  %1238 = vmatpush.bf16.msra.mxu3 %v2228_v20 }
 0x101   : > { %1154 = vmatpush.bf16.msra.mxu2 %v2208_v21 }
 0x102   : > { %v654_v24 = vpop.permute.xlu0 %653 }
 0x103   : > { %v694_v25 = vsel %vm686_vm6, %v685_v23, %v654_v24  ;;  %v2219_v23 = vld [vmem:[%s2770_s28 + $0x70] sm:$0xff] }
 0x104   : > { %v2227_v24 = vld [vmem:[%s2770_s28 + $0xb0] sm:$0xff]  ;;  %1085 = vmatpush.bf16.msra.mxu1 %v2219_v23 }
 0x105   : > { %1239 = vmatpush.bf16.msra.mxu3 %v2227_v24  ;;  %1155 = vmatpush.bf16.msra.mxu2 %v2207_v31 }
 0x106   : > { %1918 = vmatmul.msk.bf16.gmra.mxu0 %vm735_vm7, %v692_v17 }
 0x116   : > { %1919 = vmatmul.msk.bf16.gmra.mxu0 %vm735_vm7, %v694_v25 }
 0x163   : > { %v2897_v26 = vpop.f32.mrf.mxu0 }
 0x164   : > { %v794_v33 = vmul.f32 %v2897_v26, %v2897_v26 }
 0x16b   : > { %v2899_v27 = vpop.f32.mrf.mxu0 }
 0x16c   : > { %v795_v32 = vmul.f32 %v2899_v27, %v2899_v27  ;;  %v774_v34 = vadd.f32 %v2899_v27, %v2897_v26 }
 0x16e   : > { %v801_v38 = vadd.f32 %v795_v32, %v794_v33  ;;  %v2218_v33 = vld [vmem:[%s2770_s28 + $0x68] sm:$0xff] }
 0x16f   : > { %1086 = vmatpush.bf16.msra.mxu1 %v2218_v33 }
 0x173   : > { %v2901_v28 = vpop.f32.mrf.mxu0  ;;  %1087 = vmatpush.bf16.msra.mxu1 %v2217_v44  ;;  %v2236_v44 = vld [vmem:[%s2770_s28 + $0xf8] sm:$0xff] }
 0x174   : > { %v796_v35 = vmul.f32 %v2901_v28, %v2901_v28  ;;  %v775_v39 = vadd.f32 %v774_v34, %v2901_v28  ;;  %v2226_v34 = vld [vmem:[%s2770_s28 + $0xa8] sm:$0xff] }
 0x175   : > { %1240 = vmatpush.bf16.msra.mxu3 %v2226_v34 }
 0x176   : > { %v802_v41 = vadd.f32 %v801_v38, %v796_v35  ;;  %v2206_v35 = vld [vmem:[%s2770_s28 + $0x8] sm:$0xff] }
 0x177   : > { %1156 = vmatpush.bf16.msra.mxu2 %v2206_v35 }
 0x17b   : > { %v2903_v29 = vpop.f32.mrf.mxu0 }
 0x17c   : > { %v797_v40 = vmul.f32 %v2903_v29, %v2903_v29  ;;  %v776_v42 = vadd.f32 %v775_v39, %v2903_v29  ;;  %v2353_v39 = vld [vmem:[%s529_s30] ss:$0 sm:$0xff]  ;;  %s1895_s30 = sshll.u32 %s2758_s9, 6 }
 0x17d   : > { %s3028_s13 = scalar_lea.vmem [#allocation8], %s1895_s30  ;;  %s1655_s30 = scalar_lea.sflag [#allocation5], %s2758_s9 }
 0x17e   : > { %v803_v45 = vadd.f32 %v802_v41, %v797_v40 }
 0x183   : > { %v2905_v30 = vpop.f32.mrf.mxu0 }
 0x184   : > { %v798_v43 = vmul.f32 %v2905_v30, %v2905_v30  ;;  %v777_v46 = vadd.f32 %v776_v42, %v2905_v30 }
 0x186   : > { %v804_v48 = vadd.f32 %v803_v45, %v798_v43  ;;  %v2225_v45 = vld [vmem:[%s2770_s28 + $0xa0] sm:$0xff] }
 0x187   : > { %1241 = vmatpush.bf16.msra.mxu3 %v2225_v45 }
 0x18b   : > { %v2915_v36 = vpop.f32.mrf.mxu0 }
 0x18c   : > { %v799_v47 = vmul.f32 %v2915_v36, %v2915_v36  ;;  %v778_v49 = vadd.f32 %v777_v46, %v2915_v36  ;;  %v2205_v46 = vld [vmem:[%s2770_s28] sm:$0xff] }
 0x18d   : > { %1157 = vmatpush.bf16.msra.mxu2 %v2205_v46 }
 0x18e   : > { %v805_v52 = vadd.f32 %v804_v48, %v799_v47 }
 0x191   : > { %1420 = vmatpush.bf16.msrb.mxu2 %v2244_v62 }
 0x193   : > { %v2927_v50 = vpop.f32.mrf.mxu0 }
 0x194   : > { %v779_v53 = vadd.f32 %v778_v49, %v2927_v50  ;;  %v800_v54 = vmul.f32 %v2927_v50, %v2927_v50 }
 0x196   : > { %v780_v55 = vrot.slane %v779_v53, 4  ;;  %v806_v56 = vadd.f32 %v805_v52, %v800_v54  ;;  %v2224_v54 = vld [vmem:[%s2770_s28 + $0x98] sm:$0xff] }
 0x197   : > { %1242 = vmatpush.bf16.msra.mxu3 %v2224_v54  ;;  %v2239_v54 = vld [vmem:[%s2770_s28 + $0x110] sm:$0xff] }
 0x198   : > { %v781_v58 = vadd.f32 %v780_v55, %v779_v53  ;;  %v807_v59 = vrot.slane %v806_v56, 4 }
 0x19a   : > { %v782_v60 = vrot.slane %v781_v58, 2  ;;  %v808_v61 = vadd.f32 %v807_v59, %v806_v56 }
 0x19b   : > { %v770_v63 = vpop.f32.mrf.mxu0 }
 0x19c   : > { %v783_v2 = vadd.f32 %v782_v60, %v781_v58  ;;  %v809_v3 = vrot.slane %v808_v61, 2 }
 0x19e   : > { %v784_v4 = vrot.slane %v783_v2, 1  ;;  %v810_v5 = vadd.f32 %v809_v3, %v808_v61  ;;  %v2215_v3 = vld [vmem:[%s2770_s28 + $0x50] sm:$0xff] }
 0x1a0   : > { %v785_v0 = vadd.f32 %v784_v4, %v783_v2  ;;  %v811_v7 = vrot.slane %v810_v5, 1  ;;  %v2223_v4 = vld [vmem:[%s2770_s28 + $0x90] sm:$0xff] }
 0x1a1   : > { %1243 = vmatpush.bf16.msra.mxu3 %v2223_v4 }
 0x1a2   : > { %v2933_v10 = vmul.f32 %v792_v6, %v785_v0  ;;  %v812_v11 = vadd.f32 %v811_v7, %v810_v5  ;;  %v2243_v5 = vld [vmem:[%s2770_s28 + $0x130] sm:$0xff] }
 0x1a3   : > { %1421 = vmatpush.bf16.msrb.mxu2 %v2243_v5  ;;  %v2237_v5 = vld [vmem:[%s2770_s28 + $0x100] sm:$0xff] }
 0x1a4   : > { %v813_v12 = vmul.f32 %v812_v11, %v792_v6  ;;  %v814_v13 = vmul.f32 %v2933_v10, %v2933_v10  ;;  %v817_v40 = vsub.f32 %v2897_v26, %v2933_v10  ;;  %v818_v41 = vsub.f32 %v2899_v27, %v2933_v10  ;;  %v2354_v27 = vld [vmem:[%s532_s10] ss:$0 sm:$0xff] }
 0x1a5   : > { %v819_v42 = vsub.f32 %v2901_v28, %v2933_v10  ;;  %v820_v43 = vsub.f32 %v2903_v29, %v2933_v10  ;;  %v821_v47 = vsub.f32 %v2905_v30, %v2933_v10  ;;  %v822_v28 = vsub.f32 %v2915_v36, %v2933_v10  ;;  %v2216_v30 = vld [vmem:[%s2770_s28 + $0x58] sm:$0xff] }
 0x1a6   : > { %v815_v14 = vsub.f32 %v813_v12, %v814_v13  ;;  %v823_v29 = vsub.f32 %v2927_v50, %v2933_v10  ;;  %1088 = vmatpush.bf16.msra.mxu1 %v2216_v30 }
 0x1a8   : > { %v816_v15 = vmax.f32 %v815_v14, 0.0 }
 0x1aa   : > { %v824_v17 = vadd.f32 1e-05, %v816_v15  ;;  %1089 = vmatpush.bf16.msra.mxu1 %v2215_v3  ;;  %v2214_v15 = vld [vmem:[%s2770_s28 + $0x48] sm:$0xff] }
 0x1ac   : > { %2360 = vrsqrt.f32 %v824_v17  ;;  %vm831_vm10 = vweird.f32 %v824_v17 }
 0x1ae   : > { %1090 = vmatpush.bf16.msra.mxu1 %v2214_v15 }
 0x1b2   : > { %v2361_v9 = vpop.eup %2360 }
 0x1b3   : > { %v826_v22 = vmul.f32 %v2361_v9, %v824_v17  ;;  %vm832_vm9 = vweird.f32 %v2361_v9  ;;  %v2222_v17 = vld [vmem:[%s2770_s28 + $0x88] sm:$0xff] }
 0x1b4   : > { %vm833_vm11 = vmor %vm831_vm10, %vm832_vm9  ;;  %1244 = vmatpush.bf16.msra.mxu3 %v2222_v17 }
 0x1b5   : > { %v827_v25 = vmul.f32 %v2361_v9, %v826_v22 }
 0x1b7   : > { %v828_v32 = vmul.f32 0.5, %v827_v25 }
 0x1b9   : > { %v829_v37 = vsub.f32 1.5, %v828_v32  ;;  %v2213_v32 = vld [vmem:[%s2770_s28 + $0x40] sm:$0xff] }
 0x1ba   : > { %1091 = vmatpush.bf16.msra.mxu1 %v2213_v32 }
 0x1bb   : > { %v830_v38 = vmul.f32 %v2361_v9, %v829_v37 }
 0x1bd   : > { %v834_v48 = vsel %vm833_vm11, %v2361_v9, %v830_v38  ;;  %v2242_v9 = vld [vmem:[%s2770_s28 + $0x128] sm:$0xff]  ;;  %v2221_v38 = vld [vmem:[%s2770_s28 + $0x80] sm:$0xff] }
 0x1be   : > { %v835_v49 = vmul.f32 %v834_v48, %v817_v40  ;;  %v836_v26 = vmul.f32 %v834_v48, %v818_v41  ;;  %v837_v51 = vmul.f32 %v834_v48, %v819_v42  ;;  %v838_v52 = vmul.f32 %v834_v48, %v820_v43  ;;  %1422 = vmatpush.bf16.msrb.mxu2 %v2242_v9  ;;  %v2241_v41 = vld [vmem:[%s2770_s28 + $0x120] sm:$0xff] }
 0x1bf   : > { %v839_v53 = vmul.f32 %v834_v48, %v821_v47  ;;  %v840_v59 = vmul.f32 %v834_v48, %v822_v28  ;;  %v841_v60 = vmul.f32 %v834_v48, %v823_v29  ;;  %1245 = vmatpush.bf16.msra.mxu3 %v2221_v38  ;;  %1329 = vmatpush.bf16.msrb.mxu1 %v2236_v44 }
 0x1c0   : > { %v845_v55 = vmul.f32 %v2353_v39, %v835_v49  ;;  %v846_v56 = vmul.f32 %v2353_v39, %v836_v26  ;;  %v847_v57 = vmul.f32 %v2353_v39, %v837_v51  ;;  %v848_v58 = vmul.f32 %v2353_v39, %v838_v52  ;;  %v2235_v49 = vld [vmem:[%s2770_s28 + $0xf0] sm:$0xff]  ;;  %v2240_v51 = vld [vmem:[%s2770_s28 + $0x118] sm:$0xff] }
 0x1c1   : > { %v849_v61 = vmul.f32 %v2353_v39, %v839_v53  ;;  %v850_v10 = vmul.f32 %v2353_v39, %v840_v59  ;;  %v851_v11 = vmul.f32 %v2353_v39, %v841_v60  ;;  %v2234_v53 = vld [vmem:[%s2770_s28 + $0xe8] sm:$0xff] }
 0x1c2   : > { %v855_v36 = vadd.f32 %v2354_v27, %v845_v55  ;;  %v856_v63 = vadd.f32 %v2354_v27, %v846_v56  ;;  %v857_v2 = vadd.f32 %v2354_v27, %v847_v57  ;;  %v858_v50 = vadd.f32 %v2354_v27, %v848_v58  ;;  %1423 = vmatpush.bf16.msrb.mxu2 %v2241_v41 }
 0x1c3   : > { %v859_v12 = vadd.f32 %v2354_v27, %v849_v61  ;;  %v860_v22 = vadd.f32 %v2354_v27, %v850_v10  ;;  %v861_v24 = vadd.f32 %v2354_v27, %v851_v11  ;;  %1330 = vmatpush.bf16.msrb.mxu1 %v2235_v49  ;;  %v2233_v61 = vld [vmem:[%s2770_s28 + $0xe0] sm:$0xff] }
 0x1c4   : > { %v862_v6 = vmax.f32 %v855_v36, 0.0  ;;  %v863_v0 = vmax.f32 %v856_v63, 0.0  ;;  %v864_v7 = vmax.f32 %v857_v2, 0.0  ;;  %v865_v8 = vmax.f32 %v858_v50, 0.0  ;;  %v2238_v36 = vld [vmem:[%s2770_s28 + $0x108] sm:$0xff]  ;;  %v2229_v11 = vld [vmem:[%s2770_s28 + $0xc0] sm:$0xff] }
 0x1c5   : > { %v866_v25 = vmax.f32 %v859_v12, 0.0  ;;  %v867_v42 = vmax.f32 %v860_v22, 0.0  ;;  %v868_v46 = vmax.f32 %v861_v24, 0.0 }
 0x1c6   : > { %v876_v13 = vrot.slane %v862_v6, 4  ;;  %v877_v1 = vrot.slane %v863_v0, 4  ;;  %v878_v14 = vrot.slane %v864_v7, 4  ;;  %v1920_v16 = vrot.slane %v862_v6, 10  ;;  %1424 = vmatpush.bf16.msrb.mxu2 %v2240_v51 }
 0x1c7   : > { %v879_v18 = vrot.slane %v865_v8, 4  ;;  %v1922_v20 = vrot.slane %v863_v0, 10  ;;  %v1924_v23 = vrot.slane %v864_v7, 10  ;;  %v1926_v33 = vrot.slane %v865_v8, 10  ;;  %1331 = vmatpush.bf16.msrb.mxu1 %v2234_v53 }
 0x1c8   : > { %v1921_v19 = vrot.slane %v876_v13, 10  ;;  %v1923_v21 = vrot.slane %v877_v1, 10  ;;  %v1925_v31 = vrot.slane %v878_v14, 10  ;;  %v932_v34 = vmax.f32 %v862_v6, %v1920_v16  ;;  %v2232_v6 = vld [vmem:[%s2770_s28 + $0xd8] sm:$0xff] }
 0x1c9   : > { %v934_v37 = vmax.f32 %v863_v0, %v1922_v20  ;;  %v1927_v39 = vrot.slane %v879_v18, 10  ;;  %v936_v43 = vmax.f32 %v864_v7, %v1924_v23  ;;  %v880_v47 = vrot.slane %v866_v25, 4  ;;  %v2231_v0 = vld [vmem:[%s2770_s28 + $0xd0] sm:$0xff] }
 0x1ca   : > { %v933_v35 = vmax.f32 %v876_v13, %v1921_v19  ;;  %v935_v40 = vmax.f32 %v877_v1, %v1923_v21  ;;  %960 = vst [vmem:[#allocation1] ss:$4 sm:$0xff] %v932_v34  ;;  %v937_v45 = vmax.f32 %v878_v14, %v1925_v31  ;;  %v938_v48 = vmax.f32 %v865_v8, %v1926_v33  ;;  %v2230_v8 = vld [vmem:[%s2770_s28 + $0xc8] sm:$0xff] }
 0x1cb   : > { %964 = vst [vmem:[#allocation1 + $0x2] ss:$4 sm:$0xff] %v934_v37  ;;  %v939_v26 = vmax.f32 %v879_v18, %v1927_v39  ;;  %v881_v52 = vrot.slane %v867_v42, 4  ;;  %v1928_v27 = vrot.slane %v866_v25, 10  ;;  %v882_v28 = vrot.slane %v868_v46, 4  ;;  %1425 = vmatpush.bf16.msrb.mxu2 %v2239_v54  ;;  %1332 = vmatpush.bf16.msrb.mxu1 %v2233_v61 }
 0x1cc   : > { %962 = vst [vmem:[#allocation1 + $0x1] ss:$4 sm:$0xff] %v933_v35  ;;  %v1929_v29 = vrot.slane %v880_v47, 10  ;;  %v1930_v30 = vrot.slane %v867_v42, 10  ;;  %v1932_v56 = vrot.slane %v868_v46, 10  ;;  %v2567_v53 = vmov 20.0  }
 0x1cd   : > { %966 = vst [vmem:[#allocation1 + $0x3] ss:$4 sm:$0xff] %v935_v40  ;;  %v1931_v55 = vrot.slane %v881_v52, 10  ;;  %v940_v57 = vmax.f32 %v866_v25, %v1928_v27  ;;  %v1933_v58 = vrot.slane %v882_v28, 10  ;;  %2362 = vrcp.f32 %v2567_v53 }
 0x1ce   : > { %968 = vst [vmem:[#allocation1 + $0x20] ss:$4 sm:$0xff] %v936_v43  ;;  %v941_v59 = vmax.f32 %v880_v47, %v1929_v29  ;;  %v942_v62 = vmax.f32 %v867_v42, %v1930_v30  ;;  %v944_v2 = vmax.f32 %v868_v46, %v1932_v56 }
 0x1cf   : > { %970 = vst [vmem:[#allocation1 + $0x21] ss:$4 sm:$0xff] %v937_v45  ;;  %v943_v63 = vmax.f32 %v881_v52, %v1931_v55  ;;  %v945_v50 = vmax.f32 %v882_v28, %v1933_v58  ;;  %1426 = vmatpush.bf16.msrb.mxu2 %v2238_v36  ;;  %1333 = vmatpush.bf16.msrb.mxu1 %v2232_v6 }
 0x1d0   : > { %972 = vst [vmem:[#allocation1 + $0x22] ss:$4 sm:$0xff] %v938_v48 }
 0x1d1   : > { %974 = vst [vmem:[#allocation1 + $0x23] ss:$4 sm:$0xff] %v939_v26 }
 0x1d3   : > { %1427 = vmatpush.bf16.msrb.mxu2 %v2237_v5  ;;  %1334 = vmatpush.bf16.msrb.mxu1 %v2231_v0 }
 0x1d4   : > { %v975_v60 = vld.sshfl [vmem:[#allocation1] sm:$0xff pattern:$0x73625140] }
 0x1d5   : > { %977 = vst [vmem:[#allocation1] ss:$4 sm:$0xff] %v940_v57  ;;  %v2363_v57 = vpop.eup %2362 }
 0x1d6   : > { %978 = vst [vmem:[#allocation1 + $0x1] ss:$4 sm:$0xff] %v941_v59  ;;  %vm1458_vm13 = vweird.f32 %v2363_v57 }
 0x1d7   : > { %979 = vst [vmem:[#allocation1 + $0x2] ss:$4 sm:$0xff] %v942_v62  ;;  %1335 = vmatpush.bf16.msrb.mxu1 %v2230_v8 }
 0x1d8   : > { %v976_v3 = vld.sshfl [vmem:[#allocation1 + $0x20] sm:$0xff pattern:$0x73625140]  ;;  %980 = vst [vmem:[#allocation1 + $0x3] ss:$4 sm:$0xff] %v943_v63  ;;  %v1454_v63 = vmul.f32 20.0, %v2363_v57 }
 0x1d9   : > { %981 = vst [vmem:[#allocation1 + $0x20] ss:$4 sm:$0xff] %v944_v2  ;;  %v996_v4 = vpack.c.bf16 %v976_v3, %v975_v60 }
 0x1da   : > { %982 = vst [vmem:[#allocation1 + $0x21] ss:$4 sm:$0xff] %v945_v50  ;;  %v1455_v6 = vsub.f32 1.0, %v1454_v63 }
 0x1db   : > { %990 = vst [vmem:[#allocation2 + $0x8] sm:$0xff] %v976_v3  ;;  %1158 = vmatmul.bf16.vlgmr.msra.gmra.mxu2 %v996_v4  ;;  %1336 = vmatpush.bf16.msrb.mxu1 %v2229_v11 }
 0x1dc   : > { %989 = vst [vmem:[#allocation2] sm:$0xff] %v975_v60 }
 0x1df   : > { %v983_v7 = vld.sshfl [vmem:[#allocation1] sm:$0xff pattern:$0x73625140] }
 0x1e0   : > { %991 = vst [vmem:[#allocation2 + $0x10] sm:$0xff] %v983_v7  ;;  %v1353_v22 = vpack.c.bf16 %v983_v7, %v976_v3 }
 0x1e1   : > { %v984_v10 = vld.sshfl [vmem:[#allocation1 + $0x20] sm:$0xff pattern:$0x73625140] }
 0x1e2   : > { %992 = vst [vmem:[#allocation2 + $0x18] sm:$0xf] %v984_v10 }
 0x1e3   : > { %v1014_v12 = vld [vmem:[#allocation2 + $0x2] sm:$0xff] }
 0x1e4   : > { %v1168_v13 = vld [vmem:[#allocation2 + $0x4] sm:$0xff] }
 0x1e5   : > { %v1259_v25 = vld [vmem:[#allocation2 + $0x6] sm:$0xff] }
 0x1e7   : > { %v1015_v1 = vld [vmem:[#allocation2 + $0xa] sm:$0xff]  ;;  %v1016_v19 = vld [vmem:[#allocation2 + $0x12] sm:$0xf] }
 0x1e8   : > { %v1169_v14 = vld [vmem:[#allocation2 + $0xc] sm:$0xff]  ;;  %v1017_v16 = vpack.c.bf16 %v1015_v1, %v1014_v12  ;;  %v1170_v20 = vld [vmem:[#allocation2 + $0x14] sm:$0xf]  ;;  %v1018_v21 = vpack.c.bf16 %v1016_v19, %v1016_v19  ;;  %v1456_v1 = vmul.f32 %v2363_v57, %v1455_v6 }
 0x1e9   : > { %v995_v15 = vld [vmem:[#allocation2 + $0x10] sm:$0xf]  ;;  %v1171_v17 = vpack.c.bf16 %v1169_v14, %v1168_v13  ;;  %v1172_v9 = vpack.c.bf16 %v1170_v20, %v1170_v20  ;;  %v1352_v24 = vld [vmem:[#allocation2 + $0x18] sm:$0xf] }
 0x1ea   : > { %v997_v18 = vpack.c.bf16 %v995_v15, %v995_v15  ;;  %1092 = vmatmul.bf16.vlgmr.msra.gmra.mxu1 %v1017_v16  ;;  %v1260_v23 = vld [vmem:[#allocation2 + $0xe] sm:$0xff]  ;;  %v1354_v32 = vpack.c.bf16 %v1352_v24, %v1352_v24  ;;  %v1261_v33 = vld [vmem:[#allocation2 + $0x16] sm:$0xf]  ;;  %v1457_v19 = vadd.f32 %v2363_v57, %v1456_v1 }
 0x1eb   : > { %1246 = vmatmul.bf16.vlgmr.msra.gmra.mxu3 %v1171_v17  ;;  %v1262_v31 = vpack.c.bf16 %v1260_v23, %v1259_v25  ;;  %v1263_v34 = vpack.c.bf16 %v1261_v33, %v1261_v33  ;;  %v2252_v16 = vld [vmem:[%s3028_s13 + $0x38] sm:$0xff] }
 0x1ec   : > { %1163 = vmatmul.bf16.gmra.mxu2 %v997_v18  ;;  %1628 = vmatpush.bf16.msrb.mxu3 %v2252_v16  ;;  %v1459_v24 = vsel %vm1458_vm13, %v2363_v57, %v1457_v19 }
 0x1fa   : > { %1097 = vmatmul.bf16.gmra.mxu1 %v1018_v21 }
 0x1fb   : > { %1251 = vmatmul.bf16.gmra.mxu3 %v1172_v9  ;;  %v2251_v9 = vld [vmem:[%s3028_s13 + $0x30] sm:$0xff] }
 0x1fc   : > { %1428 = vmatmul.bf16.vlgmr.msrb.gmra.mxu2 %v1353_v22  ;;  %1629 = vmatpush.bf16.msrb.mxu3 %v2251_v9 }
 0x20a   : > { %1337 = vmatmul.bf16.vlgmr.msrb.gmra.mxu1 %v1262_v31 }
 0x20c   : > { %1433 = vmatmul.bf16.gmra.mxu2 %v1354_v32  ;;  %v2250_v32 = vld [vmem:[%s3028_s13 + $0x28] sm:$0xff] }
 0x20d   : > { %1630 = vmatpush.bf16.msrb.mxu3 %v2250_v32 }
 0x21a   : > { %1342 = vmatmul.bf16.gmra.mxu1 %v1263_v34 }
 0x25e   : > { %v1159_v35 = vpop.f32.mrf.mxu2 }
 0x266   : > { %v1161_v37 = vpop.f32.mrf.mxu2 }
 0x267   : > { %v1093_v38 = vpop.f32.mrf.mxu1 }
 0x268   : > { %v1160_v27 = vadd.f32 %v1159_v35, %v1093_v38  ;;  %v2249_v38 = vld [vmem:[%s3028_s13 + $0x20] sm:$0xff] }
 0x269   : > { %1631 = vmatpush.bf16.msrb.mxu3 %v2249_v38 }
 0x26e   : > { %v1247_v39 = vpop.f32.mrf.mxu3 }
 0x26f   : > { %v1164_v40 = vpop.f32.mrf.mxu2  ;;  %v1095_v41 = vpop.f32.mrf.mxu1  ;;  %v1256_v30 = vadd.f32 %v1247_v39, %v1160_v27 }
 0x270   : > { %v1162_v51 = vadd.f32 %v1161_v37, %v1095_v41  ;;  %v2248_v41 = vld [vmem:[%s3028_s13 + $0x18] sm:$0xff] }
 0x271   : > { %1632 = vmatpush.bf16.msrb.mxu3 %v2248_v41 }
 0x276   : > { %v1249_v42 = vpop.f32.mrf.mxu3 }
 0x277   : > { %v1166_v43 = vpop.f32.mrf.mxu2  ;;  %v1098_v44 = vpop.f32.mrf.mxu1  ;;  %v1257_v28 = vadd.f32 %v1249_v42, %v1162_v51 }
 0x278   : > { %v1165_v56 = vadd.f32 %v1164_v40, %v1098_v44  ;;  %v2247_v43 = vld [vmem:[%s3028_s13 + $0x10] sm:$0xff]  ;;  %v2246_v44 = vld [vmem:[%s3028_s13 + $0x8] sm:$0xff] }
 0x279   : > { %1633 = vmatpush.bf16.msrb.mxu3 %v2247_v43 }
 0x27d   : > { %1634 = vmatpush.bf16.msrb.mxu3 %v2246_v44 }
 0x27e   : > { %v1252_v45 = vpop.f32.mrf.mxu3 }
 0x27f   : > { %v1429_v46 = vpop.f32.mrf.mxu2  ;;  %v1100_v47 = vpop.f32.mrf.mxu1  ;;  %v1258_v59 = vadd.f32 %v1252_v45, %v1165_v56  ;;  %v2356_v56 = vld [vmem:[%s538_s22] ss:$0 sm:$0xff]  ;;  %s3160_s22 = sld [smem:[#allocation25_spill]] }
 0x280   : > { %v2245_v47 = vld [vmem:[%s3028_s13] sm:$0xff] }
 0x281   : > { %1635 = vmatpush.bf16.msrb.mxu3 %v2245_v47 }
 0x285   : > { %s1671_s21 = scalar_lea.hbm %s3160_s22, %s2281_s19  ;;  %s2476_s29 = scalar_lea.hbm %s3160_s22, 30 }
 0x286   : > { %v1254_v48 = vpop.f32.mrf.mxu3  ;;  %s1674_s6 = sshll.u32 %s1671_s21, 4  ;;  %s1675_s6 = int_to_ptr.hbm [resolvable:$true] %s1674_s6 }
 0x287   : > { %v1431_v49 = vpop.f32.mrf.mxu2  ;;  %v1338_v26 = vpop.f32.mrf.mxu1  ;;  %s2470_s13 = sshra.s32 %s1675_s6, 4  ;;  %s2471_s13 = int_to_ptr.hbm [resolvable:$true] %s2470_s13 }
 0x288   : > { %v1347_v55 = vadd.f32 %v1338_v26, %v1256_v30  ;;  %s2472_s4 = scalar_lea.hbm %s2471_s13, 10  ;;  %p2477_p9 = scmp.lt.s32.totalorder %s2471_s13, %s3160_s22 }
 0x289   : > { %p2473_p12 = scmp.ne.s32.totalorder %s2471_s13, %s2472_s4  ;;  %p2478_p13 = scmp.lt.s32.totalorder %s2476_s29, %s2472_s4 }
 0x28a   : > { %v3014_v61 = vadd.f32 %v1429_v46, %v1347_v55 }
 0x28b   : > { %p2474_p1 = pnand %p2473_p12, %p2669_p10  ;;  %p2479_p0 = por %p2478_p13, %p2477_p9 }
 0x28c   : > { %v1461_v3 = vmul.f32 %v3014_v61, %v3014_v61 }
 0x28d   : > { %p2475_p3 = pneg %p2474_p1 }
 0x28f   : > { %v1434_v52 = vpop.f32.mrf.mxu2  ;;  %v1340_v29 = vpop.f32.mrf.mxu1  ;;  %p2480_p2 = pnand %p2479_p0, %p2475_p3 }
 0x290   : > { %v1348_v54 = vadd.f32 %v1340_v29, %v1257_v28  ;;  %v2355_v29 = vld [vmem:[%s535_s27] ss:$0 sm:$0xff]  ;;  %s1672_s27 = sshll.u32 %s519_s15, 4  ;;  %s1673_s27 = int_to_ptr.vmem [resolvable:$true] %s1672_s27 }
 0x292   : > { %v3012_v58 = vadd.f32 %v1431_v49, %v1348_v54 }
 0x294   : > { %v1462_v2 = vmul.f32 %v3012_v58, %v3012_v58  ;;  %v1443_v4 = vadd.f32 %v3012_v58, %v3014_v61 }
 0x296   : > { %v1464_v7 = vadd.f32 %v1462_v2, %v1461_v3 }
 0x297   : > { %v1436_v60 = vpop.f32.mrf.mxu2  ;;  %v1343_v62 = vpop.f32.mrf.mxu1 }
 0x298   : > { %v1349_v36 = vadd.f32 %v1343_v62, %v1258_v59 }
 0x29a   : > { %v3018_v50 = vadd.f32 %v1434_v52, %v1349_v36 }
 0x29c   : > { %v1445_v5 = vsel %vm1444_vm12, %v3018_v50, 0.0  ;;  %v1463_v0 = vmul.f32 %v3018_v50, %v3018_v50 }
 0x29d   : > { %v1446_v8 = vadd.f32 %v1445_v5, %v1443_v4 }
 0x29e   : > { %v1465_v10 = vsel %vm1444_vm12, %v1463_v0, 0.0 }
 0x29f   : > { %v1447_v11 = vrot.slane %v1446_v8, 4  ;;  %v1466_v12 = vadd.f32 %v1465_v10, %v1464_v7  ;;  %v1345_v13 = vpop.f32.mrf.mxu1 }
 0x2a1   : > { %v1448_v14 = vadd.f32 %v1447_v11, %v1446_v8  ;;  %v1467_v15 = vrot.slane %v1466_v12, 4 }
 0x2a3   : > { %v1449_v17 = vrot.slane %v1448_v14, 2  ;;  %v1468_v18 = vadd.f32 %v1467_v15, %v1466_v12 }
 0x2a5   : > { %v1450_v20 = vadd.f32 %v1449_v17, %v1448_v14  ;;  %v1469_v21 = vrot.slane %v1468_v18, 2 }
 0x2a7   : > { %v1451_v22 = vrot.slane %v1450_v20, 1  ;;  %v1470_v23 = vadd.f32 %v1469_v21, %v1468_v18 }
 0x2a9   : > { %v1452_v25 = vadd.f32 %v1451_v22, %v1450_v20  ;;  %v1471_v31 = vrot.slane %v1470_v23, 1 }
 0x2ab   : > { %v1460_v33 = vmul.f32 %v1459_v24, %v1452_v25  ;;  %v1472_v34 = vadd.f32 %v1471_v31, %v1470_v23 }
 0x2ad   : > { %v1473_v35 = vmul.f32 %v1472_v34, %v1459_v24  ;;  %v1474_v37 = vmul.f32 %v1460_v33, %v1460_v33  ;;  %v1477_v52 = vsub.f32 %v3014_v61, %v1460_v33  ;;  %v1478_v27 = vsub.f32 %v3012_v58, %v1460_v33 }
 0x2ae   : > { %v1479_v28 = vsub.f32 %v3018_v50, %v1460_v33 }
 0x2af   : > { %v1475_v39 = vsub.f32 %v1473_v35, %v1474_v37 }
 0x2b1   : > { %v1476_v40 = vmax.f32 %v1475_v39, 0.0 }
 0x2b3   : > { %v1480_v42 = vadd.f32 1e-05, %v1476_v40 }
 0x2b5   : > { %2364 = vrsqrt.f32 %v1480_v42  ;;  %vm1487_vm15 = vweird.f32 %v1480_v42 }
 0x2bb   : > { %v2365_v45 = vpop.eup %2364 }
 0x2bc   : > { %v1482_v46 = vmul.f32 %v2365_v45, %v1480_v42  ;;  %vm1488_vm14 = vweird.f32 %v2365_v45 }
 0x2bd   : > { %vm1489_vm0 = vmor %vm1487_vm15, %vm1488_vm14 }
 0x2be   : > { %v1483_v48 = vmul.f32 %v2365_v45, %v1482_v46 }
 0x2c0   : > { %v1484_v49 = vmul.f32 0.5, %v1483_v48 }
 0x2c2   : > { %v1485_v26 = vsub.f32 1.5, %v1484_v49 }
 0x2c4   : > { %v1486_v51 = vmul.f32 %v2365_v45, %v1485_v26 }
 0x2c6   : > { %v1490_v53 = vsel %vm1489_vm0, %v2365_v45, %v1486_v51 }
 0x2c7   : > { %v1491_v30 = vmul.f32 %v1490_v53, %v1477_v52  ;;  %v1492_v54 = vmul.f32 %v1490_v53, %v1478_v27  ;;  %v1493_v55 = vmul.f32 %v1490_v53, %v1479_v28 }
 0x2c9   : > { %v1497_v57 = vmul.f32 %v2355_v29, %v1491_v30  ;;  %v1498_v59 = vmul.f32 %v2355_v29, %v1492_v54  ;;  %v1499_v58 = vmul.f32 %v2355_v29, %v1493_v55 }
 0x2cb   : > { %v1503_v60 = vadd.f32 %v2356_v56, %v1497_v57  ;;  %v1504_v61 = vadd.f32 %v2356_v56, %v1498_v59  ;;  %v1505_v62 = vadd.f32 %v2356_v56, %v1499_v58 }
 0x2cd   : > { %v1506_v36 = vmax.f32 %v1503_v60, 0.0  ;;  %v1507_v63 = vmax.f32 %v1504_v61, 0.0  ;;  %v1508_v2 = vmax.f32 %v1505_v62, 0.0 }
 0x2cf   : > { %v1512_v50 = vrot.slane %v1506_v36, 4  ;;  %v1513_v3 = vrot.slane %v1507_v63, 4  ;;  %v2158_v4 = vrot.slane %v1506_v36, 10  ;;  %v2160_v5 = vrot.slane %v1507_v63, 10 }
 0x2d0   : > { %v2162_v6 = vrot.slane %v1508_v2, 10 }
 0x2d1   : > { %v2159_v0 = vrot.slane %v1512_v50, 10  ;;  %v2161_v7 = vrot.slane %v1513_v3, 10  ;;  %v1531_v8 = vmax.f32 %v1506_v36, %v2158_v4  ;;  %v1533_v10 = vmax.f32 %v1507_v63, %v2160_v5 }
 0x2d2   : > { %v1535_v11 = vmax.f32 %v1508_v2, %v2162_v6 }
 0x2d3   : > { %v1532_v12 = vmax.f32 %v1512_v50, %v2159_v0  ;;  %v1534_v13 = vmax.f32 %v1513_v3, %v2161_v7  ;;  %1546 = vst [vmem:[#allocation1] ss:$4 sm:$0xff] %v1531_v8 }
 0x2d4   : > { %1550 = vst [vmem:[#allocation1 + $0x2] ss:$4 sm:$0xff] %v1533_v10 }
 0x2d5   : > { %1554 = vst [vmem:[#allocation1 + $0x20] ss:$4 sm:$0xff] %v1535_v11 }
 0x2d6   : > { %1548 = vst [vmem:[#allocation1 + $0x1] ss:$4 sm:$0xff] %v1532_v12 }
 0x2d7   : > { %1552 = vst [vmem:[#allocation1 + $0x3] ss:$4 sm:$0xff] %v1534_v13 }
 0x2d8   : > { %1536 = vst [vmem:[%s519_s15] sm:$0x3] %v1531_v8 }
 0x2d9   : > { %1537 = vst [vmem:[%s519_s15 + $0x2] sm:$0x3] %v1532_v12 }
 0x2da   : > { %1538 = vst [vmem:[%s519_s15 + $0x4] sm:$0x3] %v1533_v10 }
 0x2db   : > { %1539 = vst [vmem:[%s519_s15 + $0x6] sm:$0x3] %v1534_v13 }
 0x2dc   : > { %1540 = vst [vmem:[%s519_s15 + $0x8] sm:$0x3] %v1535_v11  ;;  %v1556_v14 = vld.sshfl [vmem:[#allocation1 + $0x20] sm:$0xff pattern:$0x73625140] }
 0x2de   : > { %v1555_v1 = vld.sshfl [vmem:[#allocation1] sm:$0xff pattern:$0x73625140] }
 0x2df   : > { %v1559_v15 = vpack.c.bf16 %v1556_v14, %v1555_v1 }
 0x2e1   : > { %1636 = vmatmul.bf16.vlgmr.msrb.gmra.mxu3 %v1559_v15 }
 0x2e2   : > { %2483 = shalt.err (!%p2480_p2)
}
 0x2e3   : > { %s2568_s20 = smov 2   ;;  %v2357_v16 = vld [vmem:[%s541_s8] ss:$0 sm:$0xff]  ;;  %s3161_s25 = smul.u32 10, %s2758_s9 }
 0x2e4   : > { %2289 = dma.vmem_to_hbm [thread:$0]  (%p2669_p10), %s1673_s27, 160, %s1675_s6, %s1655_s30, %s2564_s11, %s2564_s11, %s2568_s20  }
 0x2e5   : > { %s526_s13 = scalar_lea.vmem [#allocation10], %s3161_s25  ;;  %s3162_s24 = sld [smem:[#allocation26_spill]] }
 0x2e6   : > { %s1689_s27 = sshll.u32 %s526_s13, 4  ;;  %s1660_s8 = scalar_lea.sflag [#allocation11], %s2758_s9  ;;  %s1690_s27 = int_to_ptr.vmem [resolvable:$true] %s1689_s27 }
 0x2eb   : > { %s1688_s29 = scalar_lea.hbm %s3162_s24, %s2281_s19  ;;  %s2504_s15 = scalar_lea.hbm %s3162_s24, 30 }
 0x2ec   : > { %s1691_s26 = sshll.u32 %s1688_s29, 4  ;;  %s1692_s26 = int_to_ptr.hbm [resolvable:$true] %s1691_s26 }
 0x2ed   : > { %s2498_s6 = sshra.s32 %s1692_s26, 4  ;;  %s2499_s6 = int_to_ptr.hbm [resolvable:$true] %s2498_s6 }
 0x2ee   : > { %s2500_s30 = scalar_lea.hbm %s2499_s6, 10  ;;  %p2505_p8 = scmp.lt.s32.totalorder %s2499_s6, %s3162_s24 }
 0x2ef   : > { %p2501_p4 = scmp.ne.s32.totalorder %s2499_s6, %s2500_s30  ;;  %p2506_p6 = scmp.lt.s32.totalorder %s2504_s15, %s2500_s30 }
 0x2f1   : > { %p2502_p5 = pnand %p2501_p4, %p2669_p10  ;;  %p2507_p12 = por %p2506_p6, %p2505_p8 }
 0x2f3   : > { %p2503_p7 = pneg %p2502_p5 }
 0x2f5   : > { %p2508_p1 = pnand %p2507_p12, %p2503_p7 }
 0x364   : > { %v1637_v17 = vpop.f32.mrf.mxu3 }
 0x365   : > { %v1638_v18 = vadd.f32 %v2357_v16, %v1637_v17 }
 0x367   : > { %v1643_v19 = vrot.slane %v1638_v18, 2  ;;  %v1644_v20 = vrot.slane %v1638_v18, 4  ;;  %v1645_v21 = vrot.slane %v1638_v18, 6  ;;  %1649 = vst [vmem:[%s526_s13] sm:$0x3] %v1638_v18 }
 0x369   : > { %1650 = vst [vmem:[%s526_s13 + $0x2] sm:$0x3] %v1643_v19 }
 0x36a   : > { %1651 = vst [vmem:[%s526_s13 + $0x4] sm:$0x3] %v1644_v20 }
 0x36b   : > { %1652 = vst [vmem:[%s526_s13 + $0x6] sm:$0x3] %v1645_v21 }
 0x36c   : > { %v1639_v9 = vpop.f32.mrf.mxu3 }
 0x36d   : > { %v1640_v22 = vadd.f32 %v2357_v16, %v1639_v9 }
 0x36f   : > { %1653 = vst [vmem:[%s526_s13 + $0x8] sm:$0x3] %v1640_v22 }
 0x370   : > { %2511 = shalt.err (!%p2508_p1)
}
 0x371   : > { %2290 = dma.vmem_to_hbm [thread:$0]  (%p2669_p10), %s1690_s27, 160, %s1692_s26, %s1660_s8, %s2564_s11, %s2564_s11, %s2568_s20  }
 0x372 PF: > { %s3163_s9 = sld [smem:[#allocation16_spill]]  ;;  %p2311_p3 = scmp.ge.s32.totalorder %s2558_s16, 2 }
 0x374   : > { %p2304_p9 = pnand %p2311_p3, %p2673_p11 }
 0x376   : > { %p2305_p13 = pneg %p2304_p9 }
 0x378   : > { %s1706_s13 = sand.u32 1, %s3163_s9  }
 0x379   : > { %s1707_s4 = scalar_lea.sflag [#allocation5], %s1706_s13 }
 0x37a   : > { %2537 = dma.done.wait (%p2305_p13), %s1707_s4, 160  }
 0x37b   : > { %2539 = vsyncadd (%p2305_p13), %s1707_s4, 4294967136  ;;  %s1717_s10 = scalar_lea.sflag [#allocation11], %s1706_s13 }
 0x37c   : > { %2541 = dma.done.wait (%p2305_p13), %s1717_s10, 160  }
 0x37d   : > { %2543 = vsyncadd (%p2305_p13), %s1717_s10, 4294967136  ;;  %s3165_s16 = sld [smem:[#allocation18_spill]]  ;;  %s3168_s13 = smov %s2550_s14 }
 0x37e   : > { %s3166_s28 = sld [smem:[#allocation17_spill]] }
 0x37f   : > { %s3167_s15 = sld [smem:[#allocation19_spill]] }
 0x383   : > { %p30_p10 = scmp.ge.s32.totalorder %s3165_s16, 5  }
 0x384   : > { %s3169_s14 = smov %s3166_s28 }
 0x385   :  { %32 = sbr.rel (!%p30_p10) target bundleno = 15 (0xf), region = 172 }
 0x38a   :  { %1723 = vsyncpa [#allocation4], 1 }
 0x38b   :  { %1725 = vsyncpa [#allocation4 + $0x1], 1 }
 0x38c   :  { %1726 = vsyncpa [#allocation7], 1 }
 0x38d   :  { %1728 = vsyncpa [#allocation7 + $0x1], 1 }
 0x38e   :  { %1729 = vsyncpa [#allocation5], 1 }
 0x38f   :  { %1731 = vsyncpa [#allocation5 + $0x1], 1 }
 0x390   :  { %1732 = vsyncpa [#allocation11], 1 }
 0x391   :  { %1734 = vsyncpa [#allocation11 + $0x1], 1 }

</bundles_post_ra>
